<compile_context>
chip_gen: v7x
topology: tpu7x:2x2x1
jax: 0.10.0
libtpu: 0.0.40
codegen_flags: <defaults>
</compile_context>

<pallas_src>
import functools

import jax
import jax.numpy as jnp
from jax.experimental import pallas as pl
from jax.experimental.pallas import tpu as pltpu

_MASK_VALUE = -1e30


def _round_up(x, m):
    return ((x + m - 1) // m) * m


def _block_spec(shape, index_map, buffers=None):
    """BlockSpec with an optional explicit pipeline buffer count (safe fallback)."""
    if buffers is not None and hasattr(pl, "Buffered"):
        try:
            return pl.BlockSpec(shape, index_map, pipeline_mode=pl.Buffered(buffers))
        except TypeError:
            pass
    return pl.BlockSpec(shape, index_map)


def _vmem_cap_bytes():
    """Per-generation VMEM budget, leaving headroom for compiler-internal scratch."""
    phys = 64 * 1024 * 1024  # conservative fallback (v7x-sized part)
    try:
        info = pltpu.get_tpu_info()
        cap = int(getattr(info, "vmem_capacity_bytes", 0) or 0)
        if cap > 0:
            phys = cap
    except Exception:
        pass
    # 80% of physical (v7x: ~51 of 64 MiB; v5e/v6e: ~102 of 128 MiB), ceiling 104 MiB.
    return min(int(0.80 * phys), 104 * 1024 * 1024)


def _supports_bf16_eup():
    """bf16 transcendentals (EUP) exist on v6e and later; conservative default False."""
    try:
        kind = jax.devices()[0].device_kind.lower()
        return any(tag in kind for tag in ("v6", "v7"))
    except Exception:
        return False


def _self_attn_kernel(x_ref, wq_ref, bq_ref, wkv_ref, bkv_ref, mask_ref, gamma_ref,
                      out_ref, attn_ref, kv_scr, *,
                      tq, c_pad, kv_pad, compute_dtype, approx_recip, bf16_exp):
    # x_ref block:   (1, N_pad, C_pad)  f32 (exact residual), resident per batch element
    # wq/wkv:        (C_pad, KV_pad)    compute_dtype, pre-transposed + channel-packed
    # bq/bkv:        (1, KV_pad)        f32
    # mask_ref:      (1, N_pad)         f32 additive key mask (0 valid / -1e30 padded)
    # out block:     (1, Tq, C_pad)     f32
    # attn block:    (1, Tq, N_pad)     compute_dtype
    # kv_scr:        (N_pad, KV_pad)    compute_dtype; v in cols [0, C), k in [C, C+Cq)
    qt = pl.program_id(1)
    n_pad = kv_scr.shape[0]

    # Fused K/V 1x1-conv projection: computed once per batch element (qt == 0), cached
    # in VMEM scratch across the sequential ("arbitrary") query-tile axis.  Chunked so
    # the f32 matmul temporaries stay bounded at (Tq, KV_pad) rather than (N_pad, KV_pad).
    @pl.when(qt == 0)
    def _():
        wkv = wkv_ref[...]
        bkv = bkv_ref[...]
        n_chunks = n_pad // tq

        def body(i, carry):
            start = pl.multiple_of(i * tq, tq)
            xc = x_ref[0, pl.ds(start, tq), :].astype(compute_dtype)
            kv = jnp.dot(xc, wkv, preferred_element_type=jnp.float32) + bkv
            kv_scr[pl.ds(start, tq), :] = kv.astype(compute_dtype)
            return carry

        jax.lax.fori_loop(0, n_chunks, body, 0, unroll=n_chunks <= 8)

    start = pl.multiple_of(qt * tq, tq)
    x_q = x_ref[0, pl.ds(start, tq), :]                                    # (Tq, C_pad) f32

    # Q projection for this tile; w_q is packed into the same KV_pad channel layout
    # (nonzero only in the key-channel slots), so the energy contraction below runs
    # directly against the fused K/V cache and reduces exactly to <q_i, k_j>.
    q = jnp.dot(x_q.astype(compute_dtype), wq_ref[...],
                preferred_element_type=jnp.float32) + bq_ref[...]           # (Tq, KV_pad) f32

    kv = kv_scr[...]
    energy = jax.lax.dot_general(
        q.astype(compute_dtype), kv,
        dimension_numbers=(((1,), (1,)), ((), ())),
        preferred_element_type=jnp.float32)                                 # (Tq, N_pad) f32
    energy = energy + mask_ref[...]                                         # additive key mask

    # Numerically stable softmax over the key axis (f32 statistics).
    m = jnp.max(energy, axis=-1, keepdims=True)
    z = energy - m
    if bf16_exp:                      # v6e/v7x only: EUP bf16 exp at ~2x throughput
        e = jnp.exp(z.astype(jnp.bfloat16)).astype(jnp.float32)
    else:
        e = jnp.exp(z)
    denom = jnp.sum(e, axis=-1, keepdims=True)
    # approx reciprocal (bf16 path): rows sum to 1 within ~2^-12 relative error.
    attn = e * pl.reciprocal(denom, approx=approx_recip)                    # (Tq, N_pad) f32
    attn_c = attn.astype(compute_dtype)

    # out[i, :] = sum_j attn[i, j] * v[j, :]; v occupies columns [0, C) of the kv cache.
    v = kv[:, :c_pad] if kv_pad > c_pad else kv
    out_seq = jnp.dot(attn_c, v, preferred_element_type=jnp.float32)        # (Tq, C_pad) f32

    out_ref[0] = gamma_ref[0] * out_seq + x_q                               # f32 residual
    attn_ref[0] = attn_c                                                    # reuse the bf16 cast


def self_attn_forward(x_nchw, params, *, compute_dtype=jnp.bfloat16, max_tq=512,
                      bf16_exp=None):
    """x_nchw: (B, C, W, H) f32.  Returns (out (B,C,W,H) f32, attention (B,WH,WH) f32)."""
    B, C, W, H = x_nchw.shape
    N = W * H
    Cq = C // 8
    assert Cq >= 1, "in_dim must be >= 8"
    assert max_tq >= 128 and max_tq % 128 == 0

    compute_dtype = jnp.dtype(compute_dtype)
    is_bf16 = compute_dtype == jnp.dtype(jnp.bfloat16)
    if bf16_exp is None:
        bf16_exp = is_bf16 and _supports_bf16_eup()

    # Lane-dense padding.
    C_pad = _round_up(C, 128)
    N_pad = _round_up(N, 128)
    KV_pad = _round_up(C + Cq, 128)   # fused channel packing: v -> [0, C), k -> [C, C+Cq)

    itm = compute_dtype.itemsize
    attn_itm = itm

    def est_vmem(tq):
        weights = 2 * C_pad * KV_pad * itm + 2 * KV_pad * 4 + N_pad * 4    # single-buffered
        x_blk = N_pad * C_pad * 4                                          # single-buffered
        out_blk = 2 * tq * C_pad * 4
        attn_blk = 2 * tq * N_pad * attn_itm
        kv_cache = N_pad * KV_pad * itm
        temps = 5 * tq * N_pad * 4 + 3 * tq * KV_pad * 4                   # softmax / proj f32
        return weights + x_blk + out_blk + attn_blk + kv_cache + temps

    cap = _vmem_cap_bytes()
    tq = 128
    for cand in (512, 256, 128):
        if cand <= max_tq and N_pad % cand == 0 and int(1.25 * est_vmem(cand)) <= cap:
            tq = cand
            break
    n_qt = N_pad // tq
    vmem_limit = int(min(cap, max(32 * 1024 * 1024, 1.25 * est_vmem(tq))))

    wq, bq, wk, bk, wv, bv, gamma = (
        params["wq"], params["bq"], params["wk"], params["bk"],
        params["wv"], params["bv"], params["gamma"],
    )

    # (B, C, W, H) -> (B, N, C); kept f32 so the residual add is exact (matmul operands
    # are cast in-kernel).  Spatial flattening order matches torch .view(b, -1, w*h).
    x_seq = jnp.transpose(x_nchw.reshape(B, C, N), (0, 2, 1)).astype(jnp.float32)
    x_seq = jnp.pad(x_seq, ((0, 0), (0, N_pad - N), (0, C_pad - C)))

    # Fused, pre-transposed, channel-packed projection weights:
    #   kv = x @ w_kv + b_kv :  v -> columns [0, C),  k -> columns [C, C+Cq)
    #   q  = x @ w_q  + b_q  :  q -> columns [C, C+Cq) (exact zeros elsewhere), so that
    #   <q_row, kv_row> over the packed axis equals the q.k energy exactly.
    w_kv = jnp.zeros((C_pad, KV_pad), jnp.float32)
    w_kv = w_kv.at[:C, :C].set(wv.T)
    w_kv = w_kv.at[:C, C:C + Cq].set(wk.T)
    b_kv = jnp.zeros((1, KV_pad), jnp.float32)
    b_kv = b_kv.at[:, :C].set(bv)
    b_kv = b_kv.at[:, C:C + Cq].set(bk)

    w_q = jnp.zeros((C_pad, KV_pad), jnp.float32)
    w_q = w_q.at[:C, C:C + Cq].set(wq.T)
    b_q = jnp.zeros((1, KV_pad), jnp.float32)
    b_q = b_q.at[:, C:C + Cq].set(bq)

    w_kv = w_kv.astype(compute_dtype)
    w_q = w_q.astype(compute_dtype)

    # Additive key-position mask row (0 for valid keys, -1e30 for zero-padded keys).
    mask_row = jnp.where(jnp.arange(N_pad)[None, :] < N,
                         jnp.float32(0.0), jnp.float32(_MASK_VALUE))

    gamma_s = gamma.reshape((1,)).astype(jnp.float32)

    flops = B * (
        2 * N_pad * C_pad * KV_pad        # fused K/V projection
        + 2 * N_pad * C_pad * KV_pad      # Q projection (all tiles)
        + 2 * N_pad * N_pad * KV_pad      # energy
        + 2 * N_pad * N_pad * C_pad)      # attn @ V
    cost = pl.CostEstimate(
        flops=flops,
        transcendentals=B * N_pad * N_pad,
        bytes_accessed=int(
            B * N_pad * C_pad * 4                # x read
            + B * N_pad * C_pad * 4              # out write
            + B * N_pad * N_pad * attn_itm       # attention write (dominant stream)
            + 2 * C_pad * KV_pad * itm),         # weights
    )

    # TODO(synk): on v7x with B == 1, the "parallel" batch axis leaves one TensorCore
    # idle; a core-split over query tiles (recomputing K/V per core) would be required
    # to use both TensorCores for single-image inputs.
    kernel = pl.pallas_call(
        functools.partial(
            _self_attn_kernel, tq=tq, c_pad=C_pad, kv_pad=KV_pad,
            compute_dtype=compute_dtype, approx_recip=is_bf16, bf16_exp=bool(bf16_exp)),
        out_shape=(
            jax.ShapeDtypeStruct((B, N_pad, C_pad), jnp.float32),
            jax.ShapeDtypeStruct((B, N_pad, N_pad), compute_dtype),
        ),
        grid=(B, n_qt),
        in_specs=[
            _block_spec((1, N_pad, C_pad), lambda b, qt: (b, 0, 0), buffers=1),  # x (f32)
            _block_spec((C_pad, KV_pad), lambda b, qt: (0, 0), buffers=1),       # w_q packed
            _block_spec((1, KV_pad), lambda b, qt: (0, 0), buffers=1),           # b_q packed
            _block_spec((C_pad, KV_pad), lambda b, qt: (0, 0), buffers=1),       # w_kv packed
            _block_spec((1, KV_pad), lambda b, qt: (0, 0), buffers=1),           # b_kv packed
            _block_spec((1, N_pad), lambda b, qt: (0, 0), buffers=1),            # key mask row
            pl.BlockSpec(memory_space=pltpu.MemorySpace.SMEM),                   # gamma scalar
        ],
        out_specs=(
            pl.BlockSpec((1, tq, C_pad), lambda b, qt: (b, qt, 0)),              # out rows
            pl.BlockSpec((1, tq, N_pad), lambda b, qt: (b, qt, 0)),              # attention rows
        ),
        scratch_shapes=[
            pltpu.VMEM((N_pad, KV_pad), compute_dtype),      # fused K/V cache (per batch elem)
        ],
        compiler_params=pltpu.CompilerParams(
            dimension_semantics=("parallel", "arbitrary"),
            vmem_limit_bytes=vmem_limit),
        cost_estimate=cost,
    )

    out_seq_p, attn_p = kernel(x_seq, w_q, b_q, w_kv, b_kv, mask_row, gamma_s)

    # Strip padding; (B, N, C) -> (B, C, W, H).  Attention is upcast on the host for
    # interface parity with the PyTorch module (the kernel stores it in compute_dtype).
    out = jnp.transpose(out_seq_p[:, :N, :C], (0, 2, 1)).reshape(B, C, W, H)
    attn = attn_p[:, :N, :N].astype(jnp.float32)
    return out, attn


def init_params(key, in_dim):
    """Deterministic synthetic parameters (Conv2d 1x1 weights collapse to (out, in))."""
    Cq = in_dim // 8
    ks = jax.random.split(key, 6)
    scale = 0.1
    return {
        "wq": scale * jax.random.normal(ks[0], (Cq, in_dim), jnp.float32),
        "bq": scale * jax.random.normal(ks[1], (1, Cq), jnp.float32),
        "wk": scale * jax.random.normal(ks[2], (Cq, in_dim), jnp.float32),
        "bk": scale * jax.random.normal(ks[3], (1, Cq), jnp.float32),
        "wv": scale * jax.random.normal(ks[4], (in_dim, in_dim), jnp.float32),
        "bv": scale * jax.random.normal(ks[5], (1, in_dim), jnp.float32),
        # PyTorch inits gamma to 0 (residual identity); use 0.5 so the attention path
        # actually contributes and is exercised numerically.
        "gamma": jnp.array([0.5], jnp.float32),
    }


def self_attn_reference(x_nchw, params):
    """Pure-JAX reference mirroring the PyTorch forward, for correctness checking."""
    B, C, W, H = x_nchw.shape
    N = W * H
    hp = jax.lax.Precision.HIGHEST
    xf = x_nchw.reshape(B, C, N)                                             # (B, C, N)
    q = jnp.einsum("oc,bcn->bon", params["wq"], xf, precision=hp) + params["bq"].reshape(1, -1, 1)
    k = jnp.einsum("oc,bcn->bon", params["wk"], xf, precision=hp) + params["bk"].reshape(1, -1, 1)
    v = jnp.einsum("oc,bcn->bon", params["wv"], xf, precision=hp) + params["bv"].reshape(1, -1, 1)
    energy = jnp.einsum("bci,bcj->bij", q, k, precision=hp)                  # (B, N, N)
    attn = jax.nn.softmax(energy, axis=-1)
    out = jnp.einsum("bcj,bij->bci", v, attn, precision=hp)                  # (B, C, N)
    out = out.reshape(B, C, W, H)
    return params["gamma"][0] * out + x_nchw, attn


if __name__ == "__main__":
    key = jax.random.PRNGKey(0)
    kx, kp = jax.random.split(key)

    # N = 144 is NOT a multiple of 128, so the padded-key mask path is exercised, and
    # max_tq=128 gives 2 query tiles per batch element, exercising the fused K/V cache
    # reuse across the "arbitrary" grid axis.
    B, C, W, H = 2, 32, 12, 12
    x = jax.random.normal(kx, (B, C, W, H), jnp.float32)
    params = init_params(kp, C)

    out_ref, attn_ref = self_attn_reference(x, params)

    # f32 compute path: tight correctness check against the reference.
    fwd_f32 = jax.jit(functools.partial(self_attn_forward,
                                        compute_dtype=jnp.float32, max_tq=128))
    out32, attn32 = fwd_f32(x, params)
    out32 = jax.block_until_ready(out32)
    attn32 = jax.block_until_ready(attn32)
    assert out32.shape == (B, C, W, H) and attn32.shape == (B, W * H, W * H)
    assert jnp.allclose(out32, out_ref, atol=5e-4, rtol=5e-4)
    assert jnp.allclose(attn32, attn_ref, atol=5e-4, rtol=5e-4)

    # bf16 MXU path (default): f32 residual + f32 accumulation, bf16 attention output.
    fwd_bf16 = jax.jit(functools.partial(self_attn_forward,
                                         compute_dtype=jnp.bfloat16, max_tq=128))
    out16, attn16 = fwd_bf16(x, params)
    out16 = jax.block_until_ready(out16)
    attn16 = jax.block_until_ready(attn16)
    assert out16.shape == (B, C, W, H) and attn16.shape == (B, W * H, W * H)
    assert jnp.allclose(out16, out_ref, atol=3e-2, rtol=3e-2)
    assert jnp.allclose(attn16, attn_ref, atol=3e-2, rtol=3e-2)

    print("KERNEL_OK")
</pallas_src>

<mosaic_0001>
module attributes {stable_mosaic.version = 11 : i64} {
  func.func @_self_attn_kernel(%arg0: i32, %arg1: i32, %arg2: memref<1x256x128xf32, #tpu.memory_space<vmem>>, %arg3: memref<128x128xf32, #tpu.memory_space<vmem>>, %arg4: memref<1x128xf32, #tpu.memory_space<vmem>>, %arg5: memref<128x128xf32, #tpu.memory_space<vmem>>, %arg6: memref<1x128xf32, #tpu.memory_space<vmem>>, %arg7: memref<1x256xf32, #tpu.memory_space<vmem>>, %arg8: memref<1xf32, #tpu.memory_space<smem>>, %arg9: memref<1x128x128xf32, #tpu.memory_space<vmem>>, %arg10: memref<1x128x256xf32, #tpu.memory_space<vmem>>, %arg11: memref<256x128xf32, #tpu.memory_space<vmem>>) attributes {dimension_semantics = [#tpu.dimension_semantics<parallel>, #tpu.dimension_semantics<arbitrary>], iteration_bounds = array<i64: 2, 2>, scalar_prefetch = 0 : i64, scratch_operands = 1 : i64, tpu.core_type = #tpu.core_type<tc>, window_params = [{pipeline_mode = #tpu.pipeline_mode<synchronous>, transform_indices = @transform_0, window_bounds = array<i64: 1, 256, 128>}, {pipeline_mode = #tpu.pipeline_mode<synchronous>, transform_indices = @transform_1, window_bounds = array<i64: 128, 128>}, {pipeline_mode = #tpu.pipeline_mode<synchronous>, transform_indices = @transform_2, window_bounds = array<i64: 1, 128>}, {pipeline_mode = #tpu.pipeline_mode<synchronous>, transform_indices = @transform_3, window_bounds = array<i64: 128, 128>}, {pipeline_mode = #tpu.pipeline_mode<synchronous>, transform_indices = @transform_4, window_bounds = array<i64: 1, 128>}, {pipeline_mode = #tpu.pipeline_mode<synchronous>, transform_indices = @transform_5, window_bounds = array<i64: 1, 256>}, {transform_indices = @transform_6, window_bounds = array<i64: 1>}, {transform_indices = @transform_7, window_bounds = array<i64: 1, 128, 128>}, {transform_indices = @transform_8, window_bounds = array<i64: 1, 128, 256>}]} {
    %c0_i32 = arith.constant 0 : i32
    %0 = arith.cmpi eq, %arg1, %c0_i32 : i32
    %1 = arith.extui %0 : i1 to i32
    %c0_i32_0 = arith.constant 0 : i32
    %2 = arith.cmpi ne, %1, %c0_i32_0 : i32
    scf.if %2 {
      %c0_21 = arith.constant 0 : index
      %c0_22 = arith.constant 0 : index
      %39 = vector.load %arg5[%c0_21, %c0_22] : memref<128x128xf32, #tpu.memory_space<vmem>>, vector<128x128xf32>
      %c0_23 = arith.constant 0 : index
      %c0_24 = arith.constant 0 : index
      %40 = vector.load %arg6[%c0_23, %c0_24] : memref<1x128xf32, #tpu.memory_space<vmem>>, vector<1x128xf32>
      %c0_i32_25 = arith.constant 0 : i32
      %c128_i32_26 = arith.constant 128 : i32
      %41 = arith.muli %c0_i32_25, %c128_i32_26 : i32
      %42 = tpu.assume_multiple %41, 128 : i32
      %c0_27 = arith.constant 0 : index
      %43 = arith.index_cast %42 : i32 to index
      %c0_28 = arith.constant 0 : index
      %44 = vector.load %arg2[%c0_27, %43, %c0_28] : memref<1x256x128xf32, #tpu.memory_space<vmem>>, vector<1x128x128xf32>
      %45 = vector.shape_cast %44 : vector<1x128x128xf32> to vector<128x128xf32>
      %cst_29 = arith.constant dense<0.000000e+00> : vector<128x128xf32>
      %46 = tpu.matmul %45, %39, %cst_29 {dimension_numbers = #tpu.dot_dimension_numbers<[1], [0], [0], [1], [0, 0, 1, 1], [], []>} : vector<128x128xf32>, vector<128x128xf32>, vector<128x128xf32> -> vector<128x128xf32>
      %47 = vector.broadcast %40 : vector<1x128xf32> to vector<128x128xf32>
      %48 = arith.addf %46, %47 : vector<128x128xf32>
      %49 = arith.index_cast %42 : i32 to index
      %c0_30 = arith.constant 0 : index
      %50 = vector.load %arg11[%49, %c0_30] : memref<256x128xf32, #tpu.memory_space<vmem>>, vector<128x128xf32>
      tpu.vector_store %arg11[%49, %c0_30], %48 {strides = array<i32>} : memref<256x128xf32, #tpu.memory_space<vmem>>, vector<128x128xf32>,
      %c1_i32 = arith.constant 1 : i32
      %c128_i32_31 = arith.constant 128 : i32
      %51 = arith.muli %c1_i32, %c128_i32_31 : i32
      %52 = tpu.assume_multiple %51, 128 : i32
      %c0_32 = arith.constant 0 : index
      %53 = arith.index_cast %52 : i32 to index
      %c0_33 = arith.constant 0 : index
      %54 = vector.load %arg2[%c0_32, %53, %c0_33] : memref<1x256x128xf32, #tpu.memory_space<vmem>>, vector<1x128x128xf32>
      %55 = vector.shape_cast %54 : vector<1x128x128xf32> to vector<128x128xf32>
      %cst_34 = arith.constant dense<0.000000e+00> : vector<128x128xf32>
      %56 = tpu.matmul %55, %39, %cst_34 {dimension_numbers = #tpu.dot_dimension_numbers<[1], [0], [0], [1], [0, 0, 1, 1], [], []>} : vector<128x128xf32>, vector<128x128xf32>, vector<128x128xf32> -> vector<128x128xf32>
      %57 = vector.broadcast %40 : vector<1x128xf32> to vector<128x128xf32>
      %58 = arith.addf %56, %57 : vector<128x128xf32>
      %59 = arith.index_cast %52 : i32 to index
      %c0_35 = arith.constant 0 : index
      %60 = vector.load %arg11[%59, %c0_35] : memref<256x128xf32, #tpu.memory_space<vmem>>, vector<128x128xf32>
      tpu.vector_store %arg11[%59, %c0_35], %58 {strides = array<i32>} : memref<256x128xf32, #tpu.memory_space<vmem>>, vector<128x128xf32>,
      %c2_i32 = arith.constant 2 : i32
    } else {
    }
    %c128_i32 = arith.constant 128 : i32
    %3 = arith.muli %arg1, %c128_i32 : i32
    %4 = tpu.assume_multiple %3, 128 : i32
    %c0 = arith.constant 0 : index
    %5 = arith.index_cast %4 : i32 to index
    %c0_1 = arith.constant 0 : index
    %6 = vector.load %arg2[%c0, %5, %c0_1] : memref<1x256x128xf32, #tpu.memory_space<vmem>>, vector<1x128x128xf32>
    %7 = vector.shape_cast %6 : vector<1x128x128xf32> to vector<128x128xf32>
    %c0_2 = arith.constant 0 : index
    %c0_3 = arith.constant 0 : index
    %8 = vector.load %arg3[%c0_2, %c0_3] : memref<128x128xf32, #tpu.memory_space<vmem>>, vector<128x128xf32>
    %cst = arith.constant dense<0.000000e+00> : vector<128x128xf32>
    %9 = tpu.matmul %7, %8, %cst {dimension_numbers = #tpu.dot_dimension_numbers<[1], [0], [0], [1], [0, 0, 1, 1], [], []>} : vector<128x128xf32>, vector<128x128xf32>, vector<128x128xf32> -> vector<128x128xf32>
    %c0_4 = arith.constant 0 : index
    %c0_5 = arith.constant 0 : index
    %10 = vector.load %arg4[%c0_4, %c0_5] : memref<1x128xf32, #tpu.memory_space<vmem>>, vector<1x128xf32>
    %11 = vector.broadcast %10 : vector<1x128xf32> to vector<128x128xf32>
    %12 = arith.addf %9, %11 : vector<128x128xf32>
    %c0_6 = arith.constant 0 : index
    %c0_7 = arith.constant 0 : index
    %13 = vector.load %arg11[%c0_6, %c0_7] : memref<256x128xf32, #tpu.memory_space<vmem>>, vector<256x128xf32>
    %cst_8 = arith.constant dense<0.000000e+00> : vector<128x256xf32>
    %14 = tpu.matmul %12, %13, %cst_8 {dimension_numbers = #tpu.dot_dimension_numbers<[1], [1], [0], [0], [0, 0, 1, 0], [], []>} : vector<128x128xf32>, vector<256x128xf32>, vector<128x256xf32> -> vector<128x256xf32>
    %c0_9 = arith.constant 0 : index
    %c0_10 = arith.constant 0 : index
    %15 = vector.load %arg7[%c0_9, %c0_10] : memref<1x256xf32, #tpu.memory_space<vmem>>, vector<1x256xf32>
    %16 = vector.broadcast %15 : vector<1x256xf32> to vector<128x256xf32>
    %17 = arith.addf %14, %16 : vector<128x256xf32>
    %cst_11 = arith.constant dense<0xFF800000> : vector<128xf32>
    %18 = vector.multi_reduction <maximumf>, %17, %cst_11 [1] : vector<128x256xf32> to vector<128xf32>
    %19 = vector.shape_cast %18 : vector<128xf32> to vector<128x1xf32>
    %20 = vector.broadcast %19 : vector<128x1xf32> to vector<128x256xf32>
    %21 = arith.subf %17, %20 : vector<128x256xf32>
    %22 = math.exp %21 : vector<128x256xf32>
    %cst_12 = arith.constant dense<0.000000e+00> : vector<128xf32>
    %23 = vector.multi_reduction <add>, %22, %cst_12 [1] : vector<128x256xf32> to vector<128xf32>
    %24 = vector.shape_cast %23 : vector<128xf32> to vector<128x1xf32>
    %25 = tpu.reciprocal %24 : vector<128x1xf32> -> vector<128x1xf32>
    %26 = vector.broadcast %25 : vector<128x1xf32> to vector<128x256xf32>
    %27 = arith.mulf %22, %26 : vector<128x256xf32>
    %cst_13 = arith.constant dense<0.000000e+00> : vector<128x128xf32>
    %28 = tpu.matmul %27, %13, %cst_13 {dimension_numbers = #tpu.dot_dimension_numbers<[1], [0], [0], [1], [0, 0, 1, 1], [], []>} : vector<128x256xf32>, vector<256x128xf32>, vector<128x128xf32> -> vector<128x128xf32>
    %c0_14 = arith.constant 0 : index
    %29 = memref.load %arg8[%c0_14] : memref<1xf32, #tpu.memory_space<smem>>
    %30 = vector.broadcast %29 : f32 to vector<128x128xf32>
    %31 = arith.mulf %30, %28 : vector<128x128xf32>
    %32 = arith.addf %31, %7 : vector<128x128xf32>
    %c0_15 = arith.constant 0 : index
    %c0_16 = arith.constant 0 : index
    %c0_17 = arith.constant 0 : index
    %33 = vector.load %arg9[%c0_15, %c0_16, %c0_17] : memref<1x128x128xf32, #tpu.memory_space<vmem>>, vector<1x128x128xf32>
    %34 = vector.shape_cast %33 : vector<1x128x128xf32> to vector<128x128xf32>
    %35 = vector.shape_cast %32 : vector<128x128xf32> to vector<1x128x128xf32>
    tpu.vector_store %arg9[%c0_15, %c0_16, %c0_17], %35 {strides = array<i32>} : memref<1x128x128xf32, #tpu.memory_space<vmem>>, vector<1x128x128xf32>,
    %c0_18 = arith.constant 0 : index
    %c0_19 = arith.constant 0 : index
    %c0_20 = arith.constant 0 : index
    %36 = vector.load %arg10[%c0_18, %c0_19, %c0_20] : memref<1x128x256xf32, #tpu.memory_space<vmem>>, vector<1x128x256xf32>
    %37 = vector.shape_cast %36 : vector<1x128x256xf32> to vector<128x256xf32>
    %38 = vector.shape_cast %27 : vector<128x256xf32> to vector<1x128x256xf32>
    tpu.vector_store %arg10[%c0_18, %c0_19, %c0_20], %38 {strides = array<i32>} : memref<1x128x256xf32, #tpu.memory_space<vmem>>, vector<1x128x256xf32>,
    return
  }
  func.func @transform_0(%arg0: i32, %arg1: i32) -> (i32, i32, i32) {
    %c0_i32 = arith.constant 0 : i32
    %c0_i32_0 = arith.constant 0 : i32
    %c0_i32_1 = arith.constant 0 : i32
    return %arg0, %c0_i32, %c0_i32_0 : i32, i32, i32
  }
  func.func @transform_1(%arg0: i32, %arg1: i32) -> (i32, i32) {
    %c0_i32 = arith.constant 0 : i32
    %c0_i32_0 = arith.constant 0 : i32
    %c0_i32_1 = arith.constant 0 : i32
    return %c0_i32, %c0_i32_0 : i32, i32
  }
  func.func @transform_2(%arg0: i32, %arg1: i32) -> (i32, i32) {
    %c0_i32 = arith.constant 0 : i32
    %c0_i32_0 = arith.constant 0 : i32
    %c0_i32_1 = arith.constant 0 : i32
    return %c0_i32, %c0_i32_0 : i32, i32
  }
  func.func @transform_3(%arg0: i32, %arg1: i32) -> (i32, i32) {
    %c0_i32 = arith.constant 0 : i32
    %c0_i32_0 = arith.constant 0 : i32
    %c0_i32_1 = arith.constant 0 : i32
    return %c0_i32, %c0_i32_0 : i32, i32
  }
  func.func @transform_4(%arg0: i32, %arg1: i32) -> (i32, i32) {
    %c0_i32 = arith.constant 0 : i32
    %c0_i32_0 = arith.constant 0 : i32
    %c0_i32_1 = arith.constant 0 : i32
    return %c0_i32, %c0_i32_0 : i32, i32
  }
  func.func @transform_5(%arg0: i32, %arg1: i32) -> (i32, i32) {
    %c0_i32 = arith.constant 0 : i32
    %c0_i32_0 = arith.constant 0 : i32
    %c0_i32_1 = arith.constant 0 : i32
    return %c0_i32, %c0_i32_0 : i32, i32
  }
  func.func @transform_6(%arg0: i32, %arg1: i32) -> i32 {
    %c0_i32 = arith.constant 0 : i32
    %c0_i32_0 = arith.constant 0 : i32
    return %c0_i32 : i32
  }
  func.func @transform_7(%arg0: i32, %arg1: i32) -> (i32, i32, i32) {
    %c0_i32 = arith.constant 0 : i32
    %c0_i32_0 = arith.constant 0 : i32
    return %arg0, %arg1, %c0_i32 : i32, i32, i32
  }
  func.func @transform_8(%arg0: i32, %arg1: i32) -> (i32, i32, i32) {
    %c0_i32 = arith.constant 0 : i32
    %c0_i32_0 = arith.constant 0 : i32
    return %arg0, %arg1, %c0_i32 : i32, i32, i32
  }
}

</mosaic_0001>

<bundles_post_ra>
// kernel: self_attn_forward.1
= control target key start
LH: loop header
LB: loop body
LE: loop exit
PB: predicated region body
PF: predicated region fallthrough
CT: control target
= control target key end

     0   :  { %s2586_s29 = smov 0   ;;  %s2588_s30 = smov 0   ;;  %s3215_s0 = inlined_call_operand.vmem [shape: f32[2,256,128], index: 0, kind: input, shape index: {}]   ;;  %s3216_s1 = inlined_call_operand.vmem [shape: f32[128,128], index: 1, kind: input, shape index: {}]   ;;  %s3217_s2 = inlined_call_operand.vmem [shape: f32[1,128], index: 2, kind: input, shape index: {}]   ;;  %s3218_s3 = inlined_call_operand.vmem [shape: f32[128,128], index: 3, kind: input, shape index: {}]   ;;  %s3219_s4 = inlined_call_operand.vmem [shape: f32[1,128], index: 4, kind: input, shape index: {}]   ;;  %s3220_s5 = inlined_call_operand.vmem [shape: f32[1,256], index: 5, kind: input, shape index: {}]   ;;  %s3221_s6 = inlined_call_operand.<no memory space> [shape: f32[1], index: 6, kind: input, shape index: {}]   ;;  %s3222_s7 = inlined_call_operand.vmem [shape: f32[2,256,128], index: 7, kind: output, shape index: {0}]   ;;  %s3223_s8 = inlined_call_operand.vmem [shape: f32[2,256,256], index: 8, kind: output, shape index: {1}]  }
   0x1   :  { %14 = sst [smem:[#allocation3]] %s3221_s6  ;;  %s2590_s9 = smov 0  }
   0x2   :  { %s2592_s10 = smov 0   ;;  %s2594_s11 = smov 0  }
   0x3 LB: > { %s29_s6 = sadd.s32 1, %s2528_s9  ;;  %s32_s12 = sadd.s32 1, %s2532_s10  ;;  %s2536_s11 = sphi %s2594_s11, %s20_s11   ;;  %s2532_s10 = sphi %s2592_s10, %s3231_s10   ;;  %s2528_s9 = sphi %s2590_s9, %s3230_s9   ;;  %s2524_s30 = sphi %s2588_s30, %s3229_s30   ;;  %s2520_s29 = sphi %s2586_s29, %s3228_s29  }
   0x4   : > { %p30_p0 = scmp.ge.s32.totalorder %s29_s6, 2  ;;  %p1745_p1 = scmp.ge.s32.totalorder %s2536_s11, 1 }
   0x5   : > { %p282_p2 = scmp.lt.s32.totalorder %s2536_s11, 5 }
   0x6   : > { %s3233_s6 = smov (%p30_p0, %s29_s6), 0  ;;  %s3235_s12 = smov (!%p30_p0, %s32_s12), %s2532_s10 }
   0x7   : > { %3224 = sst [smem:[#allocation4_spill]] %s3233_s6  ;;  %p283_p3 = pnand %p1745_p1, %p282_p2 }
   0x8   : > { %p34_p4 = scmp.ge.s32.totalorder %s3235_s12, 2  ;;  %p330_p5 = scmp.lt.s32.totalorder (!%p283_p3), %s2524_s30, 1 }
   0x9   : > { %286 = sbr.rel (%p283_p3) target bundleno = 1360 (0x550), region = 48  ;;  %s1748_s13 = sshll.u32 (!%p283_p3), %s2520_s29, 4 }
   0xa   : > { %s3237_s12 = smov (%p34_p4, %s3235_s12), 0  ;;  %p338_p6 = scmp.lt.s32.totalorder (!%p283_p3), %s1748_s13, 31 }
   0xb   : > { %3225 = sst [smem:[#allocation5_spill]] %s3237_s12  ;;  %p1755_p7 = scmp.ne.s32.totalorder (!%p283_p3), %s2520_s29, 0 }
  0x10   : > { %s3239_s30 = smov (!%p330_p5, %s2524_s30), 1  ;;  %s3241_s13 = smov (!%p338_p6, %s1748_s13), 31 }
  0x11   : > { %s1777_s14 = sshll.u32 %s3239_s30, 8  ;;  %s1749_s15 = sshll.u32 %s3239_s30, 5  ;;  %v360_v0 = vld [vmem:[%s3218_s3] sm:$0xff] (!%p1755_p7)  ;;  %v361_v1 = vld [vmem:[%s3218_s3 + $0x8] sm:$0xff] (!%p1755_p7)  ;;  %v362_v2 = vld [vmem:[%s3218_s3 + $0x10] sm:$0xff] (!%p1755_p7) }
  0x12   : > { %s2622_s18 = scalar_lea.vmem %s3215_s0, %s1777_s14  ;;  %s341_s19 = sadd.s32 %s1749_s15, %s3241_s13  ;;  %v2186_v3 = vpack.c.bf16 (!%p1755_p7), %v361_v1, %v360_v0  ;;  %v363_v4 = vld [vmem:[%s3218_s3 + $0x18] sm:$0xff] (!%p1755_p7)  ;;  %v364_v6 = vld [vmem:[%s3218_s3 + $0x20] sm:$0xff] (!%p1755_p7)  ;;  %v365_v7 = vld [vmem:[%s3218_s3 + $0x28] sm:$0xff] (!%p1755_p7) }
  0x13   : > { %s1750_s20 = sshll.u32 %s341_s19, 3  ;;  %s1752_s21 = sshll.u32 %s3241_s13, 1  ;;  %v2190_v5 = vpack.c.bf16 (!%p1755_p7), %v363_v4, %v362_v2  ;;  %v2194_v8 = vpack.c.bf16 (!%p1755_p7), %v365_v7, %v364_v6  ;;  %v377_v9 = vld [vmem:[%s2622_s18] sm:$0xff] (!%p1755_p7)  ;;  %v366_v11 = vld [vmem:[%s3218_s3 + $0x30] sm:$0xff] (!%p1755_p7)  ;;  %v367_v12 = vld [vmem:[%s3218_s3 + $0x38] sm:$0xff] (!%p1755_p7) }
  0x14   : > { %s2627_s24 = scalar_lea.vmem %s3222_s7, %s1750_s20  ;;  %s1753_s25 = sshll.u32 %s3239_s30, 6  ;;  %2187 = vmatprep.subr.bf16.mxu0 (!%p1755_p7), %v2186_v3  ;;  %2219 = vmatprep.subr.bf16.mxu1 (!%p1755_p7), %v2186_v3  ;;  %v1757_v10 = vld [vmem:[%s2622_s18 + $0x80] sm:$0xff] (!%p1755_p7)  ;;  %v2198_v13 = vpack.c.bf16 (!%p1755_p7), %v367_v12, %v366_v11  ;;  %v369_v15 = vld [vmem:[%s3218_s3 + $0x48] sm:$0xff] (!%p1755_p7)  ;;  %v370_v17 = vld [vmem:[%s3218_s3 + $0x50] sm:$0xff] (!%p1755_p7) }
  0x15   : > { %s352_s26 = sadd.s32 %s1753_s25, %s1752_s21  ;;  %359 = sbr.rel (%p1755_p7) target bundleno = 296 (0x128), region = 52  ;;  %2189 = vmatpush3.bf16.msra.mxu0 (!%p1755_p7), %v2186_v3  ;;  %2221 = vmatpush3.bf16.msra.mxu1 (!%p1755_p7), %v2186_v3  ;;  %v368_v14 = vld [vmem:[%s3218_s3 + $0x40] sm:$0xff] (!%p1755_p7)  ;;  %v371_v18 = vld [vmem:[%s3218_s3 + $0x58] sm:$0xff] (!%p1755_p7)  ;;  %v373_v21 = vld [vmem:[%s3218_s3 + $0x68] sm:$0xff] (!%p1755_p7) }
  0x16   : > { %s1754_s27 = sshll.u32 %s352_s26, 3  ;;  %2191 = vmatprep.subr.bf16.mxu0 (!%p1755_p7), %v2190_v5  ;;  %2223 = vmatprep.subr.bf16.mxu1 (!%p1755_p7), %v2190_v5  ;;  %v2202_v16 = vpack.c.bf16 (!%p1755_p7), %v369_v15, %v368_v14  ;;  %v2206_v19 = vpack.c.bf16 (!%p1755_p7), %v371_v18, %v370_v17  ;;  %v372_v20 = vld [vmem:[%s3218_s3 + $0x60] sm:$0xff] (!%p1755_p7)  ;;  %v374_v23 = vld [vmem:[%s3218_s3 + $0x70] sm:$0xff] (!%p1755_p7)  ;;  %v375_v24 = vld [vmem:[%s3218_s3 + $0x78] sm:$0xff] (!%p1755_p7) }
  0x17   : > { %s2632_s6 = scalar_lea.vmem %s3223_s8, %s1754_s27  ;;  %2050 = vmatprep.mubr.f32.mxu0 (!%p1755_p7), %v377_v9  ;;  %2106 = vmatprep.mubr.f32.mxu1 (!%p1755_p7), %v1757_v10  ;;  %v2210_v22 = vpack.c.bf16 (!%p1755_p7), %v373_v21, %v372_v20  ;;  %v2214_v25 = vpack.c.bf16 (!%p1755_p7), %v375_v24, %v374_v23  ;;  %v378_v26 = vld [vmem:[%s2622_s18 + $0x8] sm:$0xff] (!%p1755_p7)  ;;  %v379_v28 = vld [vmem:[%s2622_s18 + $0x10] sm:$0xff] (!%p1755_p7)  ;;  %v380_v30 = vld [vmem:[%s2622_s18 + $0x18] sm:$0xff] (!%p1755_p7) }
  0x18   : > { %v1758_v27 = vld [vmem:[%s2622_s18 + $0x88] sm:$0xff] (!%p1755_p7)  ;;  %v1759_v29 = vld [vmem:[%s2622_s18 + $0x90] sm:$0xff] (!%p1755_p7)  ;;  %v1760_v31 = vld [vmem:[%s2622_s18 + $0x98] sm:$0xff] (!%p1755_p7) }
  0x19   : > { %2193 = vmatpush3.bf16.msra.mxu0 (!%p1755_p7), %v2190_v5  ;;  %2225 = vmatpush3.bf16.msra.mxu1 (!%p1755_p7), %v2190_v5  ;;  %v381_v32 = vld [vmem:[%s2622_s18 + $0x20] sm:$0xff] (!%p1755_p7)  ;;  %v382_v34 = vld [vmem:[%s2622_s18 + $0x28] sm:$0xff] (!%p1755_p7)  ;;  %v383_v36 = vld [vmem:[%s2622_s18 + $0x30] sm:$0xff] (!%p1755_p7) }
  0x1a   : > { %2195 = vmatprep.subr.bf16.mxu0 (!%p1755_p7), %v2194_v8  ;;  %2227 = vmatprep.subr.bf16.mxu1 (!%p1755_p7), %v2194_v8  ;;  %v1761_v33 = vld [vmem:[%s2622_s18 + $0xa0] sm:$0xff] (!%p1755_p7)  ;;  %v1762_v35 = vld [vmem:[%s2622_s18 + $0xa8] sm:$0xff] (!%p1755_p7)  ;;  %v1763_v37 = vld [vmem:[%s2622_s18 + $0xb0] sm:$0xff] (!%p1755_p7) }
  0x1b   : > { %v384_v38 = vld [vmem:[%s2622_s18 + $0x38] sm:$0xff] (!%p1755_p7)  ;;  %v385_v40 = vld [vmem:[%s2622_s18 + $0x40] sm:$0xff] (!%p1755_p7)  ;;  %v386_v42 = vld [vmem:[%s2622_s18 + $0x48] sm:$0xff] (!%p1755_p7) }
  0x1c   : > { %v1764_v39 = vld [vmem:[%s2622_s18 + $0xb8] sm:$0xff]  ;;  %v1765_v41 = vld [vmem:[%s2622_s18 + $0xc0] sm:$0xff]  ;;  %v1766_v43 = vld [vmem:[%s2622_s18 + $0xc8] sm:$0xff] }
  0x1d   : > { %2197 = vmatpush3.bf16.msra.mxu0 %v2194_v8  ;;  %2229 = vmatpush3.bf16.msra.mxu1 %v2194_v8  ;;  %v387_v44 = vld [vmem:[%s2622_s18 + $0x50] sm:$0xff]  ;;  %v388_v46 = vld [vmem:[%s2622_s18 + $0x58] sm:$0xff]  ;;  %v389_v48 = vld [vmem:[%s2622_s18 + $0x60] sm:$0xff] }
  0x1e   : > { %2199 = vmatprep.subr.bf16.mxu0 %v2198_v13  ;;  %2231 = vmatprep.subr.bf16.mxu1 %v2198_v13  ;;  %v1767_v45 = vld [vmem:[%s2622_s18 + $0xd0] sm:$0xff]  ;;  %v1768_v47 = vld [vmem:[%s2622_s18 + $0xd8] sm:$0xff]  ;;  %v1769_v49 = vld [vmem:[%s2622_s18 + $0xe0] sm:$0xff] }
  0x1f   : > { %v390_v50 = vld [vmem:[%s2622_s18 + $0x68] sm:$0xff]  ;;  %v391_v52 = vld [vmem:[%s2622_s18 + $0x70] sm:$0xff]  ;;  %v392_v54 = vld [vmem:[%s2622_s18 + $0x78] sm:$0xff] }
  0x20   : > { %v1770_v51 = vld [vmem:[%s2622_s18 + $0xe8] sm:$0xff]  ;;  %v1771_v53 = vld [vmem:[%s2622_s18 + $0xf0] sm:$0xff]  ;;  %v1772_v55 = vld [vmem:[%s2622_s18 + $0xf8] sm:$0xff] }
  0x21   : > { %2201 = vmatpush3.bf16.msra.mxu0 %v2198_v13  ;;  %2233 = vmatpush3.bf16.msra.mxu1 %v2198_v13  ;;  %v2718_v56 = vld [vmem:[%s3219_s4] ss:$0 sm:$0xff] }
  0x22   : > { %2203 = vmatprep.subr.bf16.mxu0 %v2202_v16  ;;  %2235 = vmatprep.subr.bf16.mxu1 %v2202_v16 }
  0x25   : > { %2205 = vmatpush3.bf16.msra.mxu0 %v2202_v16  ;;  %2237 = vmatpush3.bf16.msra.mxu1 %v2202_v16 }
  0x26   : > { %2207 = vmatprep.subr.bf16.mxu0 %v2206_v19  ;;  %2239 = vmatprep.subr.bf16.mxu1 %v2206_v19 }
  0x29   : > { %2209 = vmatpush3.bf16.msra.mxu0 %v2206_v19  ;;  %2241 = vmatpush3.bf16.msra.mxu1 %v2206_v19 }
  0x2a   : > { %2211 = vmatprep.subr.bf16.mxu0 %v2210_v22  ;;  %2243 = vmatprep.subr.bf16.mxu1 %v2210_v22 }
  0x2d   : > { %2213 = vmatpush3.bf16.msra.mxu0 %v2210_v22  ;;  %2245 = vmatpush3.bf16.msra.mxu1 %v2210_v22 }
  0x2e   : > { %2215 = vmatprep.subr.bf16.mxu0 %v2214_v25  ;;  %2247 = vmatprep.subr.bf16.mxu1 %v2214_v25 }
  0x31   : > { %2217 = vmatpush3.bf16.msra.mxu0 %v2214_v25  ;;  %2249 = vmatpush3.bf16.msra.mxu1 %v2214_v25 }
  0x34   : > { %2051 = vmatmul.mubr.f32.vlgmr.msra.gmra.mrb[0].mxu0 %v378_v26  ;;  %2107 = vmatmul.mubr.f32.vlgmr.msra.gmra.mrb[0].mxu1 %v1758_v27 }
  0x35   : > { %2053 = vmatprep.mubr.f32.mxu0 %v379_v28  ;;  %2109 = vmatprep.mubr.f32.mxu1 %v1759_v29 }
  0x38   : > { %2054 = vmatmul.mubr.f32.gmra.mrb[2].mxu0 %v380_v30  ;;  %2110 = vmatmul.mubr.f32.gmra.mrb[2].mxu1 %v1760_v31 }
  0x39   : > { %2056 = vmatprep.mubr.f32.mxu0 %v381_v32  ;;  %2112 = vmatprep.mubr.f32.mxu1 %v1761_v33 }
  0x3c   : > { %2057 = vmatmul.mubr.f32.gmra.mrb[4].mxu0 %v382_v34  ;;  %2113 = vmatmul.mubr.f32.gmra.mrb[4].mxu1 %v1762_v35 }
  0x3d   : > { %2059 = vmatprep.mubr.f32.mxu0 %v383_v36  ;;  %2115 = vmatprep.mubr.f32.mxu1 %v1763_v37 }
  0x40   : > { %2060 = vmatmul.mubr.f32.gmra.mrb[6].mxu0 %v384_v38  ;;  %2116 = vmatmul.mubr.f32.gmra.mrb[6].mxu1 %v1764_v39 }
  0x41   : > { %2062 = vmatprep.mubr.f32.mxu0 %v385_v40  ;;  %2118 = vmatprep.mubr.f32.mxu1 %v1765_v41 }
  0x44   : > { %2063 = vmatmul.mubr.f32.gmra.mrb[8].mxu0 %v386_v42  ;;  %2119 = vmatmul.mubr.f32.gmra.mrb[8].mxu1 %v1766_v43 }
  0x45   : > { %2065 = vmatprep.mubr.f32.mxu0 %v387_v44  ;;  %2121 = vmatprep.mubr.f32.mxu1 %v1767_v45 }
  0x48   : > { %2066 = vmatmul.mubr.f32.gmra.mrb[10].mxu0 %v388_v46  ;;  %2122 = vmatmul.mubr.f32.gmra.mrb[10].mxu1 %v1768_v47 }
  0x49   : > { %2068 = vmatprep.mubr.f32.mxu0 %v389_v48  ;;  %2124 = vmatprep.mubr.f32.mxu1 %v1769_v49 }
  0x4c   : > { %2069 = vmatmul.mubr.f32.gmra.mrb[12].mxu0 %v390_v50  ;;  %2125 = vmatmul.mubr.f32.gmra.mrb[12].mxu1 %v1770_v51 }
  0x4d   : > { %2071 = vmatprep.mubr.f32.mxu0 %v391_v52  ;;  %2127 = vmatprep.mubr.f32.mxu1 %v1771_v53 }
  0x50   : > { %2072 = vmatmul.mubr.f32.gmra.mrb[14].mxu0 %v392_v54  ;;  %2128 = vmatmul.mubr.f32.gmra.mrb[14].mxu1 %v1772_v55 }
 0x107   : > { %v2052_v57 = vpop.f32.mrb[0].mxu0  ;;  %v2108_v58 = vpop.f32.mrb[0].mxu1 }
 0x108   : > { %v471_v59 = vadd.f32 %v2052_v57, %v2718_v56  ;;  %v649_v60 = vadd.f32 %v2108_v58, %v2718_v56  ;;  %v465_v61 = vpop.f32.mrb[1].mxu0  ;;  %v643_v62 = vpop.f32.mrb[1].mxu1 }
 0x109   : > { %v466_v63 = vadd.f32 %v2718_v56, %v465_v61  ;;  %v644_v0 = vadd.f32 %v2718_v56, %v643_v62 }
 0x10a   : > { %545 = vst [vmem:[#allocation2 + $0x8] sm:$0xff] %v471_v59  ;;  %724 = vst [vmem:[#allocation2 + $0x88] sm:$0xff] %v649_v60 }
 0x10b   : > { %544 = vst [vmem:[#allocation2] sm:$0xff] %v466_v63  ;;  %723 = vst [vmem:[#allocation2 + $0x80] sm:$0xff] %v644_v0  ;;  %v2055_v1 = vpop.f32.mrb[2].mxu0  ;;  %v2111_v2 = vpop.f32.mrb[2].mxu1 }
 0x10c   : > { %v481_v3 = vadd.f32 %v2055_v1, %v2718_v56  ;;  %v659_v4 = vadd.f32 %v2111_v2, %v2718_v56  ;;  %v475_v5 = vpop.f32.mrb[3].mxu0  ;;  %v653_v6 = vpop.f32.mrb[3].mxu1 }
 0x10d   : > { %v476_v7 = vadd.f32 %v2718_v56, %v475_v5  ;;  %v654_v8 = vadd.f32 %v2718_v56, %v653_v6 }
 0x10e   : > { %547 = vst [vmem:[#allocation2 + $0x18] sm:$0xff] %v481_v3  ;;  %726 = vst [vmem:[#allocation2 + $0x98] sm:$0xff] %v659_v4 }
 0x10f   : > { %546 = vst [vmem:[#allocation2 + $0x10] sm:$0xff] %v476_v7  ;;  %725 = vst [vmem:[#allocation2 + $0x90] sm:$0xff] %v654_v8  ;;  %v2058_v9 = vpop.f32.mrb[4].mxu0  ;;  %v2114_v10 = vpop.f32.mrb[4].mxu1 }
 0x110   : > { %v491_v11 = vadd.f32 %v2058_v9, %v2718_v56  ;;  %v669_v12 = vadd.f32 %v2114_v10, %v2718_v56  ;;  %v485_v13 = vpop.f32.mrb[5].mxu0  ;;  %v663_v14 = vpop.f32.mrb[5].mxu1 }
 0x111   : > { %v486_v15 = vadd.f32 %v2718_v56, %v485_v13  ;;  %v664_v16 = vadd.f32 %v2718_v56, %v663_v14 }
 0x112   : > { %549 = vst [vmem:[#allocation2 + $0x28] sm:$0xff] %v491_v11  ;;  %728 = vst [vmem:[#allocation2 + $0xa8] sm:$0xff] %v669_v12 }
 0x113   : > { %548 = vst [vmem:[#allocation2 + $0x20] sm:$0xff] %v486_v15  ;;  %727 = vst [vmem:[#allocation2 + $0xa0] sm:$0xff] %v664_v16  ;;  %v2061_v17 = vpop.f32.mrb[6].mxu0  ;;  %v2117_v18 = vpop.f32.mrb[6].mxu1 }
 0x114   : > { %v501_v19 = vadd.f32 %v2061_v17, %v2718_v56  ;;  %v679_v20 = vadd.f32 %v2117_v18, %v2718_v56  ;;  %v495_v21 = vpop.f32.mrb[7].mxu0  ;;  %v673_v22 = vpop.f32.mrb[7].mxu1 }
 0x115   : > { %v496_v23 = vadd.f32 %v2718_v56, %v495_v21  ;;  %v674_v24 = vadd.f32 %v2718_v56, %v673_v22 }
 0x116   : > { %551 = vst [vmem:[#allocation2 + $0x38] sm:$0xff] %v501_v19  ;;  %730 = vst [vmem:[#allocation2 + $0xb8] sm:$0xff] %v679_v20 }
 0x117   : > { %550 = vst [vmem:[#allocation2 + $0x30] sm:$0xff] %v496_v23  ;;  %729 = vst [vmem:[#allocation2 + $0xb0] sm:$0xff] %v674_v24  ;;  %v2064_v25 = vpop.f32.mrb[8].mxu0  ;;  %v2120_v26 = vpop.f32.mrb[8].mxu1 }
 0x118   : > { %v511_v27 = vadd.f32 %v2064_v25, %v2718_v56  ;;  %v689_v28 = vadd.f32 %v2120_v26, %v2718_v56  ;;  %v505_v29 = vpop.f32.mrb[9].mxu0  ;;  %v683_v30 = vpop.f32.mrb[9].mxu1 }
 0x119   : > { %v506_v31 = vadd.f32 %v2718_v56, %v505_v29  ;;  %v684_v32 = vadd.f32 %v2718_v56, %v683_v30 }
 0x11a   : > { %553 = vst [vmem:[#allocation2 + $0x48] sm:$0xff] %v511_v27  ;;  %732 = vst [vmem:[#allocation2 + $0xc8] sm:$0xff] %v689_v28 }
 0x11b   : > { %552 = vst [vmem:[#allocation2 + $0x40] sm:$0xff] %v506_v31  ;;  %731 = vst [vmem:[#allocation2 + $0xc0] sm:$0xff] %v684_v32  ;;  %v2067_v33 = vpop.f32.mrb[10].mxu0  ;;  %v2123_v34 = vpop.f32.mrb[10].mxu1 }
 0x11c   : > { %v521_v35 = vadd.f32 %v2067_v33, %v2718_v56  ;;  %v699_v36 = vadd.f32 %v2123_v34, %v2718_v56  ;;  %v515_v37 = vpop.f32.mrb[11].mxu0  ;;  %v693_v38 = vpop.f32.mrb[11].mxu1 }
 0x11d   : > { %v516_v39 = vadd.f32 %v2718_v56, %v515_v37  ;;  %v694_v40 = vadd.f32 %v2718_v56, %v693_v38 }
 0x11e   : > { %555 = vst [vmem:[#allocation2 + $0x58] sm:$0xff] %v521_v35  ;;  %734 = vst [vmem:[#allocation2 + $0xd8] sm:$0xff] %v699_v36 }
 0x11f   : > { %554 = vst [vmem:[#allocation2 + $0x50] sm:$0xff] %v516_v39  ;;  %733 = vst [vmem:[#allocation2 + $0xd0] sm:$0xff] %v694_v40  ;;  %v2070_v41 = vpop.f32.mrb[12].mxu0  ;;  %v2126_v42 = vpop.f32.mrb[12].mxu1 }
 0x120   : > { %v531_v43 = vadd.f32 %v2070_v41, %v2718_v56  ;;  %v709_v44 = vadd.f32 %v2126_v42, %v2718_v56  ;;  %v525_v45 = vpop.f32.mrb[13].mxu0  ;;  %v703_v46 = vpop.f32.mrb[13].mxu1 }
 0x121   : > { %v526_v47 = vadd.f32 %v2718_v56, %v525_v45  ;;  %v704_v48 = vadd.f32 %v2718_v56, %v703_v46 }
 0x122   : > { %557 = vst [vmem:[#allocation2 + $0x68] sm:$0xff] %v531_v43  ;;  %736 = vst [vmem:[#allocation2 + $0xe8] sm:$0xff] %v709_v44 }
 0x123   : > { %556 = vst [vmem:[#allocation2 + $0x60] sm:$0xff] %v526_v47  ;;  %735 = vst [vmem:[#allocation2 + $0xe0] sm:$0xff] %v704_v48  ;;  %v2073_v49 = vpop.f32.mrb[14].mxu0  ;;  %v2129_v50 = vpop.f32.mrb[14].mxu1 }
 0x124   : > { %v541_v51 = vadd.f32 %v2073_v49, %v2718_v56  ;;  %v719_v52 = vadd.f32 %v2129_v50, %v2718_v56  ;;  %v535_v53 = vpop.f32.mrb[15].mxu0  ;;  %v713_v54 = vpop.f32.mrb[15].mxu1 }
 0x125   : > { %v536_v55 = vadd.f32 %v2718_v56, %v535_v53  ;;  %v714_v57 = vadd.f32 %v2718_v56, %v713_v54 }
 0x126   : > { %559 = vst [vmem:[#allocation2 + $0x78] sm:$0xff] %v541_v51  ;;  %738 = vst [vmem:[#allocation2 + $0xf8] sm:$0xff] %v719_v52 }
 0x127   : > { %558 = vst [vmem:[#allocation2 + $0x70] sm:$0xff] %v536_v55  ;;  %737 = vst [vmem:[#allocation2 + $0xf0] sm:$0xff] %v714_v57 }
 0x128 PF: > { %v757_v58 = vld [vmem:[%s3216_s1] sm:$0xff]  ;;  %v758_v59 = vld [vmem:[%s3216_s1 + $0x8] sm:$0xff]  ;;  %v759_v60 = vld [vmem:[%s3216_s1 + $0x10] sm:$0xff]  ;;  %s1773_s20 = sshll.u32 %s2520_s29, 7  ;;  %s1515_s17 = sld [smem:[#allocation3]] }
 0x129   : > { %v2250_v56 = vpack.c.bf16 %v758_v59, %v757_v58  ;;  %v760_v61 = vld [vmem:[%s3216_s1 + $0x18] sm:$0xff]  ;;  %v761_v63 = vld [vmem:[%s3216_s1 + $0x20] sm:$0xff]  ;;  %v762_v0 = vld [vmem:[%s3216_s1 + $0x28] sm:$0xff]  ;;  %s2772_s28 = scalar_lea.vmem %s2622_s18, %s1773_s20 }
 0x12a   : > { %v2254_v62 = vpack.c.bf16 %v760_v61, %v759_v60  ;;  %v2258_v1 = vpack.c.bf16 %v762_v0, %v761_v63  ;;  %v741_v2 = vld [vmem:[%s2772_s28] sm:$0xff]  ;;  %v763_v3 = vld [vmem:[%s3216_s1 + $0x30] sm:$0xff]  ;;  %v764_v4 = vld [vmem:[%s3216_s1 + $0x38] sm:$0xff] }
 0x12b   : > { %2251 = vmatprep.subr.bf16.mxu0 %v2250_v56  ;;  %2162 = vmatprep.mubr.f32.mxu0 %v741_v2  ;;  %v2262_v5 = vpack.c.bf16 %v764_v4, %v763_v3  ;;  %v765_v6 = vld [vmem:[%s3216_s1 + $0x40] sm:$0xff]  ;;  %v766_v7 = vld [vmem:[%s3216_s1 + $0x48] sm:$0xff]  ;;  %v943_v14 = vld [vmem:[#allocation2 + $0x90] sm:$0xff] }
 0x12c   : > { %2253 = vmatpush3.bf16.msra.mxu0 %v2250_v56  ;;  %v941_v8 = vld [vmem:[#allocation2 + $0x80] sm:$0xff]  ;;  %v942_v9 = vld [vmem:[#allocation2 + $0x88] sm:$0xff]  ;;  %v944_v15 = vld [vmem:[#allocation2 + $0x98] sm:$0xff]  ;;  %v2266_v16 = vpack.c.bf16 %v766_v7, %v765_v6 }
 0x12d   : > { %2255 = vmatprep.subr.bf16.mxu0 %v2254_v62  ;;  %v925_v10 = vld [vmem:[#allocation2] sm:$0xff]  ;;  %v926_v11 = vld [vmem:[#allocation2 + $0x8] sm:$0xff]  ;;  %v2282_v12 = vpack.c.bf16 %v942_v9, %v941_v8  ;;  %v2286_v17 = vpack.c.bf16 %v944_v15, %v943_v14  ;;  %v767_v18 = vld [vmem:[%s3216_s1 + $0x50] sm:$0xff] }
 0x12e   : > { %v2284_v13 = vpack.c.bf16 %v926_v11, %v925_v10  ;;  %v768_v19 = vld [vmem:[%s3216_s1 + $0x58] sm:$0xff]  ;;  %v927_v20 = vld [vmem:[#allocation2 + $0x10] sm:$0xff]  ;;  %v945_v23 = vld [vmem:[#allocation2 + $0xa0] sm:$0xff] }
 0x12f   : > { %2283 = vmatprep.subr.bf16.mxu1 %v2282_v12  ;;  %v928_v21 = vld [vmem:[#allocation2 + $0x18] sm:$0xff]  ;;  %v2270_v22 = vpack.c.bf16 %v768_v19, %v767_v18  ;;  %v946_v24 = vld [vmem:[#allocation2 + $0xa8] sm:$0xff]  ;;  %v769_v25 = vld [vmem:[%s3216_s1 + $0x60] sm:$0xff] }
 0x130   : > { %2257 = vmatpush3.bf16.msra.mxu0 %v2254_v62  ;;  %2285 = vmatpush3.bf16.xpose.msra.mxu1 %v2284_v13  ;;  %v770_v26 = vld [vmem:[%s3216_s1 + $0x68] sm:$0xff]  ;;  %v2288_v27 = vpack.c.bf16 %v928_v21, %v927_v20  ;;  %v2290_v28 = vpack.c.bf16 %v946_v24, %v945_v23  ;;  %v771_v30 = vld [vmem:[%s3216_s1 + $0x70] sm:$0xff]  ;;  %v772_v31 = vld [vmem:[%s3216_s1 + $0x78] sm:$0xff] }
 0x131   : > { %2259 = vmatprep.subr.bf16.mxu0 %v2258_v1  ;;  %2287 = vmatprep.subr.bf16.mxu1 %v2286_v17  ;;  %v2274_v29 = vpack.c.bf16 %v770_v26, %v769_v25  ;;  %v929_v32 = vld [vmem:[#allocation2 + $0x20] sm:$0xff]  ;;  %v930_v33 = vld [vmem:[#allocation2 + $0x28] sm:$0xff]  ;;  %v2278_v34 = vpack.c.bf16 %v772_v31, %v771_v30  ;;  %v947_v35 = vld [vmem:[#allocation2 + $0xb0] sm:$0xff] }
 0x132   : > { %v948_v36 = vld [vmem:[#allocation2 + $0xb8] sm:$0xff]  ;;  %v2292_v37 = vpack.c.bf16 %v930_v33, %v929_v32  ;;  %v742_v39 = vld [vmem:[%s2772_s28 + $0x8] sm:$0xff]  ;;  %v931_v40 = vld [vmem:[#allocation2 + $0x30] sm:$0xff] }
 0x133   : > { %v2294_v38 = vpack.c.bf16 %v948_v36, %v947_v35  ;;  %v932_v41 = vld [vmem:[#allocation2 + $0x38] sm:$0xff]  ;;  %v743_v42 = vld [vmem:[%s2772_s28 + $0x10] sm:$0xff]  ;;  %v949_v43 = vld [vmem:[#allocation2 + $0xc0] sm:$0xff] }
 0x134   : > { %2261 = vmatpush3.bf16.msra.mxu0 %v2258_v1  ;;  %v950_v44 = vld [vmem:[#allocation2 + $0xc8] sm:$0xff]  ;;  %v2296_v45 = vpack.c.bf16 %v932_v41, %v931_v40  ;;  %v744_v46 = vld [vmem:[%s2772_s28 + $0x18] sm:$0xff]  ;;  %v745_v48 = vld [vmem:[%s2772_s28 + $0x20] sm:$0xff] }
 0x135   : > { %2263 = vmatprep.subr.bf16.mxu0 %v2262_v5  ;;  %v2298_v47 = vpack.c.bf16 %v950_v44, %v949_v43  ;;  %v746_v49 = vld [vmem:[%s2772_s28 + $0x28] sm:$0xff]  ;;  %v933_v50 = vld [vmem:[#allocation2 + $0x40] sm:$0xff]  ;;  %v747_v52 = vld [vmem:[%s2772_s28 + $0x30] sm:$0xff] }
 0x136   : > { %v934_v51 = vld [vmem:[#allocation2 + $0x48] sm:$0xff]  ;;  %v951_v53 = vld [vmem:[#allocation2 + $0xd0] sm:$0xff]  ;;  %v952_v54 = vld [vmem:[#allocation2 + $0xd8] sm:$0xff] }
 0x137   : > { %v2300_v55 = vpack.c.bf16 %v934_v51, %v933_v50  ;;  %v748_v57 = vld [vmem:[%s2772_s28 + $0x38] sm:$0xff]  ;;  %v2302_v58 = vpack.c.bf16 %v952_v54, %v951_v53  ;;  %v749_v59 = vld [vmem:[%s2772_s28 + $0x40] sm:$0xff]  ;;  %v750_v60 = vld [vmem:[%s2772_s28 + $0x48] sm:$0xff]  ;;  %v959_v50 = vlaneseq }
 0x138   : > { %2265 = vmatpush3.bf16.msra.mxu0 %v2262_v5  ;;  %2289 = vmatpush3.bf16.xpose.msra.mxu1 %v2288_v27  ;;  %v935_v56 = vld [vmem:[#allocation2 + $0x50] sm:$0xff]  ;;  %v936_v61 = vld [vmem:[#allocation2 + $0x58] sm:$0xff]  ;;  %v953_v63 = vld [vmem:[#allocation2 + $0xe0] sm:$0xff] }
 0x139   : > { %2267 = vmatprep.subr.bf16.mxu0 %v2266_v16  ;;  %2291 = vmatprep.subr.bf16.mxu1 %v2290_v28  ;;  %v751_v62 = vld [vmem:[%s2772_s28 + $0x50] sm:$0xff]  ;;  %v954_v0 = vld [vmem:[#allocation2 + $0xe8] sm:$0xff]  ;;  %v2304_v1 = vpack.c.bf16 %v936_v61, %v935_v56  ;;  %v752_v2 = vld [vmem:[%s2772_s28 + $0x58] sm:$0xff]  ;;  %v960_v51 = vshrl.u32 %v959_v50, 7 }
 0x13a   : > { %v2306_v3 = vpack.c.bf16 %v954_v0, %v953_v63  ;;  %v753_v4 = vld [vmem:[%s2772_s28 + $0x60] sm:$0xff]  ;;  %v754_v5 = vld [vmem:[%s2772_s28 + $0x68] sm:$0xff]  ;;  %v755_v8 = vld [vmem:[%s2772_s28 + $0x70] sm:$0xff] }
 0x13b   : > { %v937_v6 = vld [vmem:[#allocation2 + $0x60] sm:$0xff]  ;;  %v938_v7 = vld [vmem:[#allocation2 + $0x68] sm:$0xff]  ;;  %v955_v9 = vld [vmem:[#allocation2 + $0xf0] sm:$0xff]  ;;  %v965_v54 = vsub.s32 1, %v960_v51 }
 0x13c   : > { %2269 = vmatpush3.bf16.msra.mxu0 %v2266_v16  ;;  %v956_v10 = vld [vmem:[#allocation2 + $0xf8] sm:$0xff]  ;;  %v2308_v11 = vpack.c.bf16 %v938_v7, %v937_v6  ;;  %v939_v14 = vld [vmem:[#allocation2 + $0x70] sm:$0xff]  ;;  %v957_v53 = vld [vmem:[%s3220_s5] sm:$0x3] }
 0x13d   : > { %2271 = vmatprep.subr.bf16.mxu0 %v2270_v22  ;;  %v940_v15 = vld [vmem:[#allocation2 + $0x78] sm:$0xff] }
 0x13e   : > { %v2312_v16 = vpack.c.bf16 %v940_v15, %v939_v14 }
 0x140   : > { %2273 = vmatpush3.bf16.msra.mxu0 %v2270_v22  ;;  %2293 = vmatpush3.bf16.xpose.msra.mxu1 %v2292_v37 }
 0x141   : > { %2275 = vmatprep.subr.bf16.mxu0 %v2274_v29  ;;  %2295 = vmatprep.subr.bf16.mxu1 %v2294_v38 }
 0x144   : > { %2277 = vmatpush3.bf16.msra.mxu0 %v2274_v29 }
 0x145   : > { %2279 = vmatprep.subr.bf16.mxu0 %v2278_v34 }
 0x148   : > { %2281 = vmatpush3.bf16.msra.mxu0 %v2278_v34  ;;  %2297 = vmatpush3.bf16.xpose.msra.mxu1 %v2296_v45 }
 0x149   : > { %2315 = vmatprep.subr.bf16.mxu0 %v2282_v12  ;;  %2299 = vmatprep.subr.bf16.mxu1 %v2298_v47  ;;  %v756_v12 = vld [vmem:[%s2772_s28 + $0x78] sm:$0xff] }
 0x14b   : > { %2163 = vmatmul.mubr.f32.vlgmr.msra.gmra.mrb[0].mxu0 %v742_v39 }
 0x14c   : > { %2165 = vmatprep.mubr.f32.mxu0 %v743_v42  ;;  %2317 = vmatpush3.bf16.msra.mxu0 %v2284_v13  ;;  %v2310_v13 = vpack.c.bf16 %v956_v10, %v955_v9 }
 0x14d   : > { %2319 = vmatprep.subr.bf16.mxu0 %v2286_v17  ;;  %v1774_v17 = vld [vmem:[%s3217_s2] ss:$0 sm:$0xff] }
 0x14f   : > { %2166 = vmatmul.mubr.f32.gmra.mrb[2].mxu0 %v744_v46 }
 0x150   : > { %2168 = vmatprep.mubr.f32.mxu0 %v745_v48  ;;  %2321 = vmatpush3.bf16.msra.mxu0 %v2288_v27 }
 0x151   : > { %2323 = vmatprep.subr.bf16.mxu0 %v2290_v28  ;;  %2301 = vmatpush3.bf16.xpose.msra.mxu1 %v2300_v55 }
 0x152   : > { %2303 = vmatprep.subr.bf16.mxu1 %v2302_v58 }
 0x153   : > { %2169 = vmatmul.mubr.f32.gmra.mrb[4].mxu0 %v746_v49 }
 0x154   : > { %2171 = vmatprep.mubr.f32.mxu0 %v747_v52  ;;  %2325 = vmatpush3.bf16.msra.mxu0 %v2292_v37  ;;  %v961_v52 = vsub.s32 0, %v960_v51 }
 0x155   : > { %2327 = vmatprep.subr.bf16.mxu0 %v2294_v38 }
 0x157   : > { %2172 = vmatmul.mubr.f32.gmra.mrb[6].mxu0 %v748_v57  ;;  %v2828_v57 = vrot.slane %v957_v53, %v965_v54 }
 0x158   : > { %2174 = vmatprep.mubr.f32.mxu0 %v749_v59  ;;  %2329 = vmatpush3.bf16.msra.mxu0 %v2296_v45 }
 0x159   : > { %2331 = vmatprep.subr.bf16.mxu0 %v2298_v47  ;;  %2305 = vmatpush3.bf16.xpose.msra.mxu1 %v2304_v1 }
 0x15a   : > { %2307 = vmatprep.subr.bf16.mxu1 %v2306_v3 }
 0x15b   : > { %2175 = vmatmul.mubr.f32.gmra.mrb[8].mxu0 %v750_v60 }
 0x15c   : > { %2177 = vmatprep.mubr.f32.mxu0 %v751_v62  ;;  %2333 = vmatpush3.bf16.msra.mxu0 %v2300_v55  ;;  %v2826_v55 = vrot.slane %v957_v53, %v961_v52 }
 0x15d   : > { %2335 = vmatprep.subr.bf16.mxu0 %v2302_v58 }
 0x15f   : > { %2178 = vmatmul.mubr.f32.gmra.mrb[10].mxu0 %v752_v2 }
 0x160   : > { %2180 = vmatprep.mubr.f32.mxu0 %v753_v4  ;;  %2337 = vmatpush3.bf16.msra.mxu0 %v2304_v1 }
 0x161   : > { %2339 = vmatprep.subr.bf16.mxu0 %v2306_v3  ;;  %2309 = vmatpush3.bf16.xpose.msra.mxu1 %v2308_v11 }
 0x162   : > { %2311 = vmatprep.subr.bf16.mxu1 %v2310_v13 }
 0x163   : > { %2181 = vmatmul.mubr.f32.gmra.mrb[12].mxu0 %v754_v5 }
 0x164   : > { %2183 = vmatprep.mubr.f32.mxu0 %v755_v8  ;;  %2341 = vmatpush3.bf16.msra.mxu0 %v2308_v11 }
 0x165   : > { %2343 = vmatprep.subr.bf16.mxu0 %v2310_v13 }
 0x167   : > { %2184 = vmatmul.mubr.f32.gmra.mrb[14].mxu0 %v756_v12 }
 0x168   : > { %2345 = vmatpush3.bf16.msra.mxu0 %v2312_v16 }
 0x169   : > { %2313 = vmatpush3.bf16.xpose.msra.mxu1 %v2312_v16 }
 0x21e   : > { %v2164_v18 = vpop.f32.mrb[0].mxu0 }
 0x21f   : > { %v846_v19 = vpop.f32.mrb[1].mxu0  ;;  %v852_v21 = vadd.f32 %v2164_v18, %v1774_v17 }
 0x220   : > { %v847_v20 = vadd.f32 %v1774_v17, %v846_v19 }
 0x222   : > { %1906 = vmatprep.mubr.f32.mxu1 %v847_v20  ;;  %v2167_v22 = vpop.f32.mrb[2].mxu0 }
 0x223   : > { %1907 = vmatmul.mubr.f32.vlgmr.msra.gmra.mrb[0].mxu1 %v847_v20  ;;  %v856_v23 = vpop.f32.mrb[3].mxu0  ;;  %v862_v27 = vadd.f32 %v2167_v22, %v1774_v17 }
 0x224   : > { %1908 = vmatprep.mubr.f32.mxu1 %v852_v21  ;;  %v857_v24 = vadd.f32 %v1774_v17, %v856_v23 }
 0x226   : > { %v2170_v25 = vpop.f32.mrb[4].mxu0 }
 0x227   : > { %1909 = vmatmul.mubr.f32.gmra.mrb[2].mxu1 %v852_v21  ;;  %v866_v26 = vpop.f32.mrb[5].mxu0  ;;  %v872_v33 = vadd.f32 %v2170_v25, %v1774_v17 }
 0x228   : > { %1910 = vmatprep.mubr.f32.mxu1 %v857_v24  ;;  %v867_v30 = vadd.f32 %v1774_v17, %v866_v26 }
 0x22a   : > { %v2173_v28 = vpop.f32.mrb[6].mxu0 }
 0x22b   : > { %1911 = vmatmul.mubr.f32.gmra.mrb[4].mxu1 %v857_v24  ;;  %v876_v29 = vpop.f32.mrb[7].mxu0  ;;  %v882_v39 = vadd.f32 %v2173_v28, %v1774_v17 }
 0x22c   : > { %1912 = vmatprep.mubr.f32.mxu1 %v862_v27  ;;  %v877_v36 = vadd.f32 %v1774_v17, %v876_v29 }
 0x22e   : > { %v2176_v31 = vpop.f32.mrb[8].mxu0 }
 0x22f   : > { %1913 = vmatmul.mubr.f32.gmra.mrb[6].mxu1 %v862_v27  ;;  %v886_v32 = vpop.f32.mrb[9].mxu0  ;;  %v892_v43 = vadd.f32 %v2176_v31, %v1774_v17 }
 0x230   : > { %1914 = vmatprep.mubr.f32.mxu1 %v867_v30  ;;  %v887_v42 = vadd.f32 %v1774_v17, %v886_v32 }
 0x232   : > { %v2179_v34 = vpop.f32.mrb[10].mxu0 }
 0x233   : > { %1915 = vmatmul.mubr.f32.gmra.mrb[8].mxu1 %v867_v30  ;;  %v896_v35 = vpop.f32.mrb[11].mxu0  ;;  %v902_v45 = vadd.f32 %v2179_v34, %v1774_v17 }
 0x234   : > { %1916 = vmatprep.mubr.f32.mxu1 %v872_v33  ;;  %v897_v44 = vadd.f32 %v1774_v17, %v896_v35 }
 0x236   : > { %v2182_v37 = vpop.f32.mrb[12].mxu0 }
 0x237   : > { %1917 = vmatmul.mubr.f32.gmra.mrb[10].mxu1 %v872_v33  ;;  %v906_v38 = vpop.f32.mrb[13].mxu0  ;;  %v912_v47 = vadd.f32 %v2182_v37, %v1774_v17 }
 0x238   : > { %1918 = vmatprep.mubr.f32.mxu1 %v877_v36  ;;  %v907_v46 = vadd.f32 %v1774_v17, %v906_v38 }
 0x23a   : > { %v2185_v40 = vpop.f32.mrb[14].mxu0 }
 0x23b   : > { %1919 = vmatmul.mubr.f32.gmra.mrb[12].mxu1 %v877_v36  ;;  %v916_v41 = vpop.f32.mrb[15].mxu0  ;;  %v922_v49 = vadd.f32 %v2185_v40, %v1774_v17 }
 0x23c   : > { %1920 = vmatprep.mubr.f32.mxu1 %v882_v39  ;;  %v917_v48 = vadd.f32 %v1774_v17, %v916_v41 }
 0x23f   : > { %1921 = vmatmul.mubr.f32.gmra.mrb[14].mxu1 %v882_v39 }
 0x240   : > { %1922 = vmatprep.mubr.f32.mxu1 %v887_v42 }
 0x243   : > { %1923 = vmatmul.mubr.f32.gmra.mrb[16].mxu1 %v887_v42 }
 0x244   : > { %1924 = vmatprep.mubr.f32.mxu1 %v892_v43 }
 0x247   : > { %1925 = vmatmul.mubr.f32.gmra.mrb[18].mxu1 %v892_v43 }
 0x248   : > { %1926 = vmatprep.mubr.f32.mxu1 %v897_v44 }
 0x24b   : > { %1927 = vmatmul.mubr.f32.gmra.mrb[20].mxu1 %v897_v44 }
 0x24c   : > { %1928 = vmatprep.mubr.f32.mxu1 %v902_v45 }
 0x24f   : > { %1929 = vmatmul.mubr.f32.gmra.mrb[22].mxu1 %v902_v45 }
 0x250   : > { %1930 = vmatprep.mubr.f32.mxu1 %v907_v46 }
 0x253   : > { %1931 = vmatmul.mubr.f32.gmra.mrb[24].mxu1 %v907_v46 }
 0x254   : > { %1932 = vmatprep.mubr.f32.mxu1 %v912_v47 }
 0x257   : > { %1933 = vmatmul.mubr.f32.gmra.mrb[26].mxu1 %v912_v47 }
 0x258   : > { %1934 = vmatprep.mubr.f32.mxu1 %v917_v48 }
 0x25b   : > { %1935 = vmatmul.mubr.f32.gmra.mrb[28].mxu1 %v917_v48 }
 0x25c   : > { %1936 = vmatprep.mubr.f32.mxu1 %v922_v49 }
 0x25f   : > { %1937 = vmatmul.mubr.f32.gmra.mrb[30].mxu1 %v922_v49 }
 0x2f6   : > { %v1035_v58 = vpop.f32.mrb[0].mxu1 }
 0x2f7   : > { %v2831_v59 = vadd.f32 %v1035_v58, %v2826_v55  ;;  %v1037_v60 = vpop.f32.mrb[1].mxu1 }
 0x2f8   : > { %v2834_v56 = vadd.f32 %v1037_v60, %v2828_v57 }
 0x2fa   : > { %v1041_v61 = vpop.f32.mrb[2].mxu1  ;;  %v1130_v62 = vmax.f32 %v2831_v59, %v2834_v56 }
 0x2fb   : > { %v2839_v63 = vadd.f32 %v1041_v61, %v2826_v55  ;;  %v1043_v0 = vpop.f32.mrb[3].mxu1 }
 0x2fc   : > { %v2842_v1 = vadd.f32 %v1043_v0, %v2828_v57  ;;  %1131 = vmax.xlane.f32.xlu0 %v1130_v62 }
 0x2fe   : > { %v1047_v2 = vpop.f32.mrb[4].mxu1  ;;  %v1133_v3 = vmax.f32 %v2839_v63, %v2842_v1 }
 0x2ff   : > { %v2847_v4 = vadd.f32 %v1047_v2, %v2826_v55  ;;  %v1049_v5 = vpop.f32.mrb[5].mxu1 }
 0x300   : > { %v2850_v6 = vadd.f32 %v1049_v5, %v2828_v57  ;;  %1134 = vmax.xlane.f32.xlu0 %v1133_v3 }
 0x302   : > { %v1053_v7 = vpop.f32.mrb[6].mxu1  ;;  %v1136_v8 = vmax.f32 %v2847_v4, %v2850_v6 }
 0x303   : > { %v2855_v9 = vadd.f32 %v1053_v7, %v2826_v55  ;;  %v1055_v10 = vpop.f32.mrb[7].mxu1 }
 0x304   : > { %v2858_v11 = vadd.f32 %v1055_v10, %v2828_v57  ;;  %1137 = vmax.xlane.f32.xlu1 %v1136_v8 }
 0x306   : > { %v1059_v12 = vpop.f32.mrb[8].mxu1  ;;  %v1139_v13 = vmax.f32 %v2855_v9, %v2858_v11 }
 0x307   : > { %v2863_v14 = vadd.f32 %v1059_v12, %v2826_v55  ;;  %v1061_v15 = vpop.f32.mrb[9].mxu1 }
 0x308   : > { %v2866_v16 = vadd.f32 %v1061_v15, %v2828_v57  ;;  %1140 = vmax.xlane.f32.xlu1 %v1139_v13 }
 0x30a   : > { %v1065_v17 = vpop.f32.mrb[10].mxu1  ;;  %v1142_v18 = vmax.f32 %v2863_v14, %v2866_v16 }
 0x30b   : > { %v2871_v19 = vadd.f32 %v1065_v17, %v2826_v55  ;;  %v1067_v20 = vpop.f32.mrb[11].mxu1 }
 0x30c   : > { %v2874_v21 = vadd.f32 %v1067_v20, %v2828_v57  ;;  %1143 = vmax.xlane.f32.xlu0 %v1142_v18 }
 0x30e   : > { %v1071_v22 = vpop.f32.mrb[12].mxu1  ;;  %v1145_v23 = vmax.f32 %v2871_v19, %v2874_v21 }
 0x30f   : > { %v2879_v24 = vadd.f32 %v1071_v22, %v2826_v55  ;;  %v1073_v25 = vpop.f32.mrb[13].mxu1 }
 0x310   : > { %v2882_v26 = vadd.f32 %v1073_v25, %v2828_v57  ;;  %1146 = vmax.xlane.f32.xlu1 %v1145_v23 }
 0x312   : > { %v1077_v27 = vpop.f32.mrb[14].mxu1  ;;  %v1148_v28 = vmax.f32 %v2879_v24, %v2882_v26 }
 0x313   : > { %v2887_v29 = vadd.f32 %v1077_v27, %v2826_v55  ;;  %v1079_v30 = vpop.f32.mrb[15].mxu1 }
 0x314   : > { %v2890_v31 = vadd.f32 %v1079_v30, %v2828_v57  ;;  %1149 = vmax.xlane.f32.xlu0 %v1148_v28 }
 0x316   : > { %v1083_v32 = vpop.f32.mrb[16].mxu1  ;;  %v1151_v33 = vmax.f32 %v2887_v29, %v2890_v31 }
 0x317   : > { %v2895_v34 = vadd.f32 %v1083_v32, %v2826_v55  ;;  %v1085_v35 = vpop.f32.mrb[17].mxu1 }
 0x318   : > { %v2898_v36 = vadd.f32 %v1085_v35, %v2828_v57  ;;  %1152 = vmax.xlane.f32.xlu1 %v1151_v33 }
 0x31a   : > { %v1089_v37 = vpop.f32.mrb[18].mxu1  ;;  %v1154_v38 = vmax.f32 %v2895_v34, %v2898_v36 }
 0x31b   : > { %v2903_v39 = vadd.f32 %v1089_v37, %v2826_v55  ;;  %v1091_v40 = vpop.f32.mrb[19].mxu1 }
 0x31c   : > { %v2906_v41 = vadd.f32 %v1091_v40, %v2828_v57  ;;  %1155 = vmax.xlane.f32.xlu0 %v1154_v38 }
 0x31e   : > { %v1095_v42 = vpop.f32.mrb[20].mxu1  ;;  %v1157_v43 = vmax.f32 %v2903_v39, %v2906_v41 }
 0x31f   : > { %v2911_v44 = vadd.f32 %v1095_v42, %v2826_v55  ;;  %v1097_v45 = vpop.f32.mrb[21].mxu1 }
 0x320   : > { %v2914_v46 = vadd.f32 %v1097_v45, %v2828_v57  ;;  %1158 = vmax.xlane.f32.xlu1 %v1157_v43 }
 0x322   : > { %v1101_v47 = vpop.f32.mrb[22].mxu1  ;;  %v1160_v48 = vmax.f32 %v2911_v44, %v2914_v46 }
 0x323   : > { %v2919_v49 = vadd.f32 %v1101_v47, %v2826_v55  ;;  %v1103_v50 = vpop.f32.mrb[23].mxu1 }
 0x324   : > { %v2922_v51 = vadd.f32 %v1103_v50, %v2828_v57  ;;  %1161 = vmax.xlane.f32.xlu0 %v1160_v48 }
 0x326   : > { %v1107_v52 = vpop.f32.mrb[24].mxu1  ;;  %v1163_v53 = vmax.f32 %v2919_v49, %v2922_v51 }
 0x327   : > { %v2927_v54 = vadd.f32 %v1107_v52, %v2826_v55  ;;  %v1109_v58 = vpop.f32.mrb[25].mxu1 }
 0x328   : > { %v2930_v60 = vadd.f32 %v1109_v58, %v2828_v57  ;;  %1164 = vmax.xlane.f32.xlu1 %v1163_v53 }
 0x32a   : > { %v1113_v61 = vpop.f32.mrb[26].mxu1  ;;  %v1166_v62 = vmax.f32 %v2927_v54, %v2930_v60 }
 0x32b   : > { %v2935_v0 = vadd.f32 %v1113_v61, %v2826_v55  ;;  %v1115_v2 = vpop.f32.mrb[27].mxu1 }
 0x32c   : > { %v2938_v3 = vadd.f32 %v1115_v2, %v2828_v57  ;;  %1167 = vmax.xlane.f32.xlu0 %v1166_v62 }
 0x32e   : > { %v1119_v5 = vpop.f32.mrb[28].mxu1  ;;  %v1169_v7 = vmax.f32 %v2935_v0, %v2938_v3 }
 0x32f   : > { %v2943_v8 = vadd.f32 %v1119_v5, %v2826_v55  ;;  %v1121_v10 = vpop.f32.mrb[29].mxu1 }
 0x330   : > { %v2946_v12 = vadd.f32 %v1121_v10, %v2828_v57  ;;  %1170 = vmax.xlane.f32.xlu1 %v1169_v7 }
 0x332   : > { %v1125_v13 = vpop.f32.mrb[30].mxu1  ;;  %v1172_v15 = vmax.f32 %v2943_v8, %v2946_v12 }
 0x333   : > { %v2951_v17 = vadd.f32 %v1125_v13, %v2826_v55  ;;  %v1127_v18 = vpop.f32.mrb[31].mxu1 }
 0x334   : > { %v2954_v20 = vadd.f32 %v1127_v18, %v2828_v57  ;;  %1173 = vmax.xlane.f32.xlu0 %v1172_v15 }
 0x336   : > { %v1175_v22 = vmax.f32 %v2951_v17, %v2954_v20 }
 0x338   : > { %1176 = vmax.xlane.f32.xlu1 %v1175_v22 }
 0x389   : > { %v1132_v23 = vpop.xlane.xlu0 %1131 }
 0x38a   : > { %v1178_v25 = vsub.f32 %v2831_v59, %v1132_v23  ;;  %v1179_v27 = vsub.f32 %v2834_v56, %v1132_v23 }
 0x38c   : > { %v1210_v28 = vmul.f32 1.442695, %v1178_v25  ;;  %v1212_v30 = vmul.f32 1.442695, %v1179_v27 }
 0x38d   : > { %v1135_v32 = vpop.xlane.xlu0 %1134 }
 0x38e   : > { %2386 = vpow2.f32 %v1210_v28  ;;  %v1180_v55 = vsub.f32 %v2839_v63, %v1135_v32  ;;  %v1181_v33 = vsub.f32 %v2842_v1, %v1135_v32 }
 0x38f   : > { %2388 = vpow2.f32 %v1212_v30 }
 0x390   : > { %v1214_v57 = vmul.f32 1.442695, %v1180_v55  ;;  %v1216_v35 = vmul.f32 1.442695, %v1181_v33 }
 0x391   : > { %v1138_v37 = vpop.xlane.xlu1 %1137 }
 0x392   : > { %2390 = vpow2.f32 %v1214_v57  ;;  %v1182_v38 = vsub.f32 %v2847_v4, %v1138_v37  ;;  %v1183_v40 = vsub.f32 %v2850_v6, %v1138_v37 }
 0x393   : > { %2392 = vpow2.f32 %v1216_v35 }
 0x394   : > { %v1218_v59 = vmul.f32 1.442695, %v1182_v38  ;;  %v1220_v56 = vmul.f32 1.442695, %v1183_v40 }
 0x395   : > { %v1141_v42 = vpop.xlane.xlu1 %1140 }
 0x396   : > { %2394 = vpow2.f32 %v1218_v59  ;;  %v1184_v43 = vsub.f32 %v2855_v9, %v1141_v42  ;;  %v1185_v63 = vsub.f32 %v2858_v11, %v1141_v42 }
 0x397   : > { %2396 = vpow2.f32 %v1220_v56 }
 0x398   : > { %v2966_v1 = vpop.eup %2386  ;;  %v1222_v45 = vmul.f32 1.442695, %v1184_v43  ;;  %v1224_v47 = vmul.f32 1.442695, %v1185_v63 }
 0x399   : > { %v2968_v48 = vpop.eup %2388  ;;  %v1144_v50 = vpop.xlane.xlu0 %1143 }
 0x39a   : > { %2398 = vpow2.f32 %v1222_v45  ;;  %v1186_v4 = vsub.f32 %v2863_v14, %v1144_v50  ;;  %v1187_v6 = vsub.f32 %v2866_v16, %v1144_v50  ;;  %v1274_v52 = vadd.f32 %v2968_v48, %v2966_v1 }
 0x39b   : > { %2400 = vpow2.f32 %v1224_v47 }
 0x39c   : > { %v2974_v9 = vpop.eup %2390  ;;  %v1226_v11 = vmul.f32 1.442695, %v1186_v4  ;;  %v1228_v53 = vmul.f32 1.442695, %v1187_v6  ;;  %1275 = vadd.xlane.f32.xlu0 %v1274_v52 }
 0x39d   : > { %v2976_v58 = vpop.eup %2392  ;;  %v1147_v61 = vpop.xlane.xlu1 %1146 }
 0x39e   : > { %2402 = vpow2.f32 %v1226_v11  ;;  %v1188_v62 = vsub.f32 %v2871_v19, %v1147_v61  ;;  %v1189_v2 = vsub.f32 %v2874_v21, %v1147_v61  ;;  %v1277_v14 = vadd.f32 %v2976_v58, %v2974_v9 }
 0x39f   : > { %2404 = vpow2.f32 %v1228_v53 }
 0x3a0   : > { %v2982_v16 = vpop.eup %2394  ;;  %v1230_v5 = vmul.f32 1.442695, %v1188_v62  ;;  %v1232_v7 = vmul.f32 1.442695, %v1189_v2  ;;  %1278 = vadd.xlane.f32.xlu1 %v1277_v14 }
 0x3a1   : > { %v2984_v10 = vpop.eup %2396  ;;  %v1150_v13 = vpop.xlane.xlu0 %1149 }
 0x3a2   : > { %2406 = vpow2.f32 %v1230_v5  ;;  %v1190_v15 = vsub.f32 %v2879_v24, %v1150_v13  ;;  %v1191_v18 = vsub.f32 %v2882_v26, %v1150_v13  ;;  %v1280_v19 = vadd.f32 %v2984_v10, %v2982_v16 }
 0x3a3   : > { %2408 = vpow2.f32 %v1232_v7 }
 0x3a4   : > { %v2990_v21 = vpop.eup %2398  ;;  %v1234_v22 = vmul.f32 1.442695, %v1190_v15  ;;  %v1236_v23 = vmul.f32 1.442695, %v1191_v18  ;;  %1281 = vadd.xlane.f32.xlu0 %v1280_v19 }
 0x3a5   : > { %v2992_v25 = vpop.eup %2400  ;;  %v1153_v27 = vpop.xlane.xlu1 %1152 }
 0x3a6   : > { %2410 = vpow2.f32 %v1234_v22  ;;  %v1192_v28 = vsub.f32 %v2887_v29, %v1153_v27  ;;  %v1193_v30 = vsub.f32 %v2890_v31, %v1153_v27  ;;  %v1283_v24 = vadd.f32 %v2992_v25, %v2990_v21 }
 0x3a7   : > { %2412 = vpow2.f32 %v1236_v23 }
 0x3a8   : > { %v2998_v26 = vpop.eup %2402  ;;  %v1238_v32 = vmul.f32 1.442695, %v1192_v28  ;;  %v1240_v55 = vmul.f32 1.442695, %v1193_v30  ;;  %1284 = vadd.xlane.f32.xlu1 %v1283_v24 }
 0x3a9   : > { %v3000_v33 = vpop.eup %2404  ;;  %v1156_v57 = vpop.xlane.xlu0 %1155 }
 0x3aa   : > { %2414 = vpow2.f32 %v1238_v32  ;;  %v1194_v35 = vsub.f32 %v2895_v34, %v1156_v57  ;;  %v1195_v37 = vsub.f32 %v2898_v36, %v1156_v57  ;;  %v1286_v29 = vadd.f32 %v3000_v33, %v2998_v26 }
 0x3ab   : > { %2416 = vpow2.f32 %v1240_v55 }
 0x3ac   : > { %v3006_v31 = vpop.eup %2406  ;;  %v1242_v38 = vmul.f32 1.442695, %v1194_v35  ;;  %v1244_v40 = vmul.f32 1.442695, %v1195_v37  ;;  %1287 = vadd.xlane.f32.xlu0 %v1286_v29 }
 0x3ad   : > { %v3008_v59 = vpop.eup %2408  ;;  %v1159_v56 = vpop.xlane.xlu1 %1158 }
 0x3ae   : > { %2418 = vpow2.f32 %v1242_v38  ;;  %v1196_v42 = vsub.f32 %v2903_v39, %v1159_v56  ;;  %v1197_v43 = vsub.f32 %v2906_v41, %v1159_v56  ;;  %v1289_v34 = vadd.f32 %v3008_v59, %v3006_v31 }
 0x3af   : > { %2420 = vpow2.f32 %v1244_v40 }
 0x3b0   : > { %v3014_v36 = vpop.eup %2410  ;;  %v1246_v63 = vmul.f32 1.442695, %v1196_v42  ;;  %v1248_v45 = vmul.f32 1.442695, %v1197_v43  ;;  %1290 = vadd.xlane.f32.xlu1 %v1289_v34 }
 0x3b1   : > { %v3016_v47 = vpop.eup %2412  ;;  %v1162_v50 = vpop.xlane.xlu0 %1161 }
 0x3b2   : > { %2422 = vpow2.f32 %v1246_v63  ;;  %v1198_v4 = vsub.f32 %v2911_v44, %v1162_v50  ;;  %v1199_v6 = vsub.f32 %v2914_v46, %v1162_v50  ;;  %v1292_v39 = vadd.f32 %v3016_v47, %v3014_v36 }
 0x3b3   : > { %2424 = vpow2.f32 %v1248_v45 }
 0x3b4   : > { %v3022_v41 = vpop.eup %2414  ;;  %v1250_v52 = vmul.f32 1.442695, %v1198_v4  ;;  %v1252_v11 = vmul.f32 1.442695, %v1199_v6  ;;  %1293 = vadd.xlane.f32.xlu0 %v1292_v39 }
 0x3b5   : > { %v3024_v53 = vpop.eup %2416  ;;  %v1165_v61 = vpop.xlane.xlu1 %1164 }
 0x3b6   : > { %2426 = vpow2.f32 %v1250_v52  ;;  %v1200_v62 = vsub.f32 %v2919_v49, %v1165_v61  ;;  %v1201_v2 = vsub.f32 %v2922_v51, %v1165_v61  ;;  %v1295_v44 = vadd.f32 %v3024_v53, %v3022_v41 }
 0x3b7   : > { %2428 = vpow2.f32 %v1252_v11 }
 0x3b8   : > { %v3030_v46 = vpop.eup %2418  ;;  %v1254_v14 = vmul.f32 1.442695, %v1200_v62  ;;  %v1256_v5 = vmul.f32 1.442695, %v1201_v2  ;;  %1296 = vadd.xlane.f32.xlu1 %v1295_v44 }
 0x3b9   : > { %v3032_v7 = vpop.eup %2420  ;;  %v1168_v13 = vpop.xlane.xlu0 %1167 }
 0x3ba   : > { %2430 = vpow2.f32 %v1254_v14  ;;  %v1202_v15 = vsub.f32 %v2927_v54, %v1168_v13  ;;  %v1203_v18 = vsub.f32 %v2930_v60, %v1168_v13  ;;  %v1298_v49 = vadd.f32 %v3032_v7, %v3030_v46 }
 0x3bb   : > { %2432 = vpow2.f32 %v1256_v5 }
 0x3bc   : > { %v3038_v51 = vpop.eup %2422  ;;  %v1258_v19 = vmul.f32 1.442695, %v1202_v15  ;;  %v1260_v22 = vmul.f32 1.442695, %v1203_v18  ;;  %1299 = vadd.xlane.f32.xlu0 %v1298_v49 }
 0x3bd   : > { %v3040_v23 = vpop.eup %2424  ;;  %v1171_v27 = vpop.xlane.xlu1 %1170 }
 0x3be   : > { %2434 = vpow2.f32 %v1258_v19  ;;  %v1204_v28 = vsub.f32 %v2935_v0, %v1171_v27  ;;  %v1205_v30 = vsub.f32 %v2938_v3, %v1171_v27  ;;  %v1301_v54 = vadd.f32 %v3040_v23, %v3038_v51 }
 0x3bf   : > { %2436 = vpow2.f32 %v1260_v22 }
 0x3c0   : > { %v3046_v60 = vpop.eup %2426  ;;  %v1262_v24 = vmul.f32 1.442695, %v1204_v28  ;;  %v1264_v32 = vmul.f32 1.442695, %v1205_v30  ;;  %1302 = vadd.xlane.f32.xlu1 %v1301_v54 }
 0x3c1   : > { %v3048_v55 = vpop.eup %2428  ;;  %v1174_v57 = vpop.xlane.xlu0 %1173 }
 0x3c2   : > { %2438 = vpow2.f32 %v1262_v24  ;;  %v1206_v35 = vsub.f32 %v2943_v8, %v1174_v57  ;;  %v1207_v37 = vsub.f32 %v2946_v12, %v1174_v57  ;;  %v1304_v0 = vadd.f32 %v3048_v55, %v3046_v60 }
 0x3c3   : > { %2440 = vpow2.f32 %v1264_v32 }
 0x3c4   : > { %v3054_v3 = vpop.eup %2430  ;;  %v1266_v29 = vmul.f32 1.442695, %v1206_v35  ;;  %v1268_v38 = vmul.f32 1.442695, %v1207_v37  ;;  %1305 = vadd.xlane.f32.xlu0 %v1304_v0 }
 0x3c5   : > { %v3056_v40 = vpop.eup %2432  ;;  %v1177_v56 = vpop.xlane.xlu1 %1176 }
 0x3c6   : > { %2442 = vpow2.f32 %v1266_v29  ;;  %v1208_v42 = vsub.f32 %v2951_v17, %v1177_v56  ;;  %v1209_v43 = vsub.f32 %v2954_v20, %v1177_v56  ;;  %v1307_v8 = vadd.f32 %v3056_v40, %v3054_v3 }
 0x3c7   : > { %2444 = vpow2.f32 %v1268_v38 }
 0x3c8   : > { %v3062_v12 = vpop.eup %2434  ;;  %v1270_v34 = vmul.f32 1.442695, %v1208_v42  ;;  %v1272_v63 = vmul.f32 1.442695, %v1209_v43  ;;  %1308 = vadd.xlane.f32.xlu1 %v1307_v8 }
 0x3c9   : > { %v3064_v45 = vpop.eup %2436 }
 0x3ca   : > { %2446 = vpow2.f32 %v1270_v34  ;;  %v1310_v50 = vadd.f32 %v3064_v45, %v3062_v12 }
 0x3cb   : > { %2448 = vpow2.f32 %v1272_v63 }
 0x3cc   : > { %v3068_v4 = vpop.eup %2438  ;;  %1311 = vadd.xlane.f32.xlu0 %v1310_v50 }
 0x3cd   : > { %v3070_v17 = vpop.eup %2440 }
 0x3ce   : > { %v1313_v20 = vadd.f32 %v3070_v17, %v3068_v4 }
 0x3d0   : > { %v3074_v6 = vpop.eup %2442  ;;  %1314 = vadd.xlane.f32.xlu1 %v1313_v20 }
 0x3d1   : > { %v3076_v39 = vpop.eup %2444 }
 0x3d2   : > { %v1316_v52 = vadd.f32 %v3076_v39, %v3074_v6 }
 0x3d4   : > { %v3080_v11 = vpop.eup %2446  ;;  %1317 = vadd.xlane.f32.xlu0 %v1316_v52 }
 0x3d5   : > { %v3082_v61 = vpop.eup %2448 }
 0x3d6   : > { %v1319_v62 = vadd.f32 %v3082_v61, %v3080_v11 }
 0x3d8   : > { %1320 = vadd.xlane.f32.xlu1 %v1319_v62 }
 0x429   : > { %v1276_v2 = vpop.xlane.xlu0 %1275 }
 0x42a   : > { %2450 = vrcp.f32 %v1276_v2 }
 0x42d   : > { %v1279_v44 = vpop.xlane.xlu1 %1278 }
 0x42e   : > { %2452 = vrcp.f32 %v1279_v44 }
 0x431   : > { %v1282_v14 = vpop.xlane.xlu0 %1281 }
 0x432   : > { %2454 = vrcp.f32 %v1282_v14 }
 0x434   : > { %v2451_v5 = vpop.eup %2450 }
 0x435   : > { %v1338_v13 = vmul.f32 %v2451_v5, %v2966_v1  ;;  %v1285_v15 = vpop.xlane.xlu1 %1284  ;;  %v1339_v18 = vmul.f32 %v2451_v5, %v2968_v48 }
 0x436   : > { %2456 = vrcp.f32 %v1285_v15 }
 0x437   : > { %1565 = vst [vmem:[%s2632_s6] sm:$0xff] %v1338_v13  ;;  %1434 = vmatprep.mubr.f32.mxu0 %v1339_v18  ;;  %1566 = vst [vmem:[%s2632_s6 + $0x8] sm:$0xff] %v1339_v18 }
 0x438   : > { %v2453_v49 = vpop.eup %2452  ;;  %1435 = vmatmul.mubr.f32.vlgmr.msra.gmra.mrb[16].mxu0 %v1338_v13 }
 0x439   : > { %v1288_v19 = vpop.xlane.xlu0 %1287  ;;  %v1341_v22 = vmul.f32 %v2453_v49, %v2976_v58  ;;  %v1340_v27 = vmul.f32 %v2453_v49, %v2974_v9 }
 0x43a   : > { %2458 = vrcp.f32 %v1288_v19  ;;  %v2482_v19 = vld [vmem:[%s2772_s28] sm:$0xff] }
 0x43b   : > { %1439 = vmatprep.mubr.f32.mxu0 %v1341_v22  ;;  %1568 = vst [vmem:[%s2632_s6 + $0x18] sm:$0xff] %v1341_v22  ;;  %1567 = vst [vmem:[%s2632_s6 + $0x10] sm:$0xff] %v1340_v27 }
 0x43c   : > { %v2455_v1 = vpop.eup %2454  ;;  %1440 = vmatmul.mubr.f32.gmra.mrb[18].mxu0 %v1340_v27 }
 0x43d   : > { %v1291_v48 = vpop.xlane.xlu1 %1290  ;;  %v1343_v28 = vmul.f32 %v2455_v1, %v2984_v10  ;;  %v1342_v30 = vmul.f32 %v2455_v1, %v2982_v16 }
 0x43e   : > { %2460 = vrcp.f32 %v1291_v48 }
 0x43f   : > { %1444 = vmatprep.mubr.f32.mxu0 %v1343_v28  ;;  %1570 = vst [vmem:[%s2632_s6 + $0x28] sm:$0xff] %v1343_v28  ;;  %1569 = vst [vmem:[%s2632_s6 + $0x20] sm:$0xff] %v1342_v30  ;;  %v2483_v28 = vld [vmem:[%s2772_s28 + $0x8] sm:$0xff] }
 0x440   : > { %v2457_v58 = vpop.eup %2456  ;;  %1445 = vmatmul.mubr.f32.gmra.mrb[20].mxu0 %v1342_v30 }
 0x441   : > { %v1294_v9 = vpop.xlane.xlu0 %1293  ;;  %v1345_v54 = vmul.f32 %v2457_v58, %v2992_v25  ;;  %v1344_v24 = vmul.f32 %v2457_v58, %v2990_v21 }
 0x442   : > { %2462 = vrcp.f32 %v1294_v9 }
 0x443   : > { %1449 = vmatprep.mubr.f32.mxu0 %v1345_v54  ;;  %1572 = vst [vmem:[%s2632_s6 + $0x38] sm:$0xff] %v1345_v54  ;;  %1571 = vst [vmem:[%s2632_s6 + $0x30] sm:$0xff] %v1344_v24 }
 0x444   : > { %v2459_v10 = vpop.eup %2458  ;;  %1450 = vmatmul.mubr.f32.gmra.mrb[22].mxu0 %v1344_v24 }
 0x445   : > { %v1297_v16 = vpop.xlane.xlu1 %1296  ;;  %v1347_v32 = vmul.f32 %v2459_v10, %v3000_v33  ;;  %v1346_v57 = vmul.f32 %v2459_v10, %v2998_v26  ;;  %v2484_v10 = vld [vmem:[%s2772_s28 + $0x10] sm:$0xff] }
 0x446   : > { %2464 = vrcp.f32 %v1297_v16 }
 0x447   : > { %1454 = vmatprep.mubr.f32.mxu0 %v1347_v32  ;;  %1574 = vst [vmem:[%s2632_s6 + $0x48] sm:$0xff] %v1347_v32  ;;  %1573 = vst [vmem:[%s2632_s6 + $0x40] sm:$0xff] %v1346_v57 }
 0x448   : > { %v2461_v25 = vpop.eup %2460  ;;  %1455 = vmatmul.mubr.f32.gmra.mrb[24].mxu0 %v1346_v57 }
 0x449   : > { %v1300_v21 = vpop.xlane.xlu0 %1299  ;;  %v1349_v35 = vmul.f32 %v2461_v25, %v3008_v59  ;;  %v1348_v37 = vmul.f32 %v2461_v25, %v3006_v31 }
 0x44a   : > { %2466 = vrcp.f32 %v1300_v21 }
 0x44b   : > { %1459 = vmatprep.mubr.f32.mxu0 %v1349_v35  ;;  %1576 = vst [vmem:[%s2632_s6 + $0x58] sm:$0xff] %v1349_v35  ;;  %1575 = vst [vmem:[%s2632_s6 + $0x50] sm:$0xff] %v1348_v37  ;;  %v2485_v35 = vld [vmem:[%s2772_s28 + $0x18] sm:$0xff] }
 0x44c   : > { %v2463_v33 = vpop.eup %2462  ;;  %1460 = vmatmul.mubr.f32.gmra.mrb[26].mxu0 %v1348_v37 }
 0x44d   : > { %v1303_v26 = vpop.xlane.xlu1 %1302  ;;  %v1351_v0 = vmul.f32 %v2463_v33, %v3016_v47  ;;  %v1350_v29 = vmul.f32 %v2463_v33, %v3014_v36 }
 0x44e   : > { %2468 = vrcp.f32 %v1303_v26 }
 0x44f   : > { %1464 = vmatprep.mubr.f32.mxu0 %v1351_v0  ;;  %1578 = vst [vmem:[%s2632_s6 + $0x68] sm:$0xff] %v1351_v0  ;;  %1577 = vst [vmem:[%s2632_s6 + $0x60] sm:$0xff] %v1350_v29 }
 0x450   : > { %v2465_v59 = vpop.eup %2464  ;;  %1465 = vmatmul.mubr.f32.gmra.mrb[28].mxu0 %v1350_v29 }
 0x451   : > { %v1306_v31 = vpop.xlane.xlu0 %1305  ;;  %v1353_v38 = vmul.f32 %v2465_v59, %v3024_v53  ;;  %v1352_v56 = vmul.f32 %v2465_v59, %v3022_v41  ;;  %v2486_v59 = vld [vmem:[%s2772_s28 + $0x20] sm:$0xff] }
 0x452   : > { %2470 = vrcp.f32 %v1306_v31 }
 0x453   : > { %1469 = vmatprep.mubr.f32.mxu0 %v1353_v38  ;;  %1580 = vst [vmem:[%s2632_s6 + $0x78] sm:$0xff] %v1353_v38  ;;  %1579 = vst [vmem:[%s2632_s6 + $0x70] sm:$0xff] %v1352_v56 }
 0x454   : > { %v2467_v47 = vpop.eup %2466  ;;  %1470 = vmatmul.mubr.f32.gmra.mrb[30].mxu0 %v1352_v56 }
 0x455   : > { %v1309_v36 = vpop.xlane.xlu1 %1308  ;;  %v1355_v42 = vmul.f32 %v2467_v47, %v3032_v7  ;;  %v1354_v43 = vmul.f32 %v2467_v47, %v3030_v46 }
 0x456   : > { %2472 = vrcp.f32 %v1309_v36 }
 0x457   : > { %1474 = vmatprep.mubr.f32.mxu0 %v1355_v42  ;;  %1582 = vst [vmem:[%s2632_s6 + $0x88] sm:$0xff] %v1355_v42  ;;  %1581 = vst [vmem:[%s2632_s6 + $0x80] sm:$0xff] %v1354_v43  ;;  %v2487_v42 = vld [vmem:[%s2772_s28 + $0x28] sm:$0xff] }
 0x458   : > { %v2469_v53 = vpop.eup %2468  ;;  %1475 = vmatmul.mubr.f32.gmra.mrb[32].mxu0 %v1354_v43 }
 0x459   : > { %v1312_v41 = vpop.xlane.xlu0 %1311  ;;  %v1357_v8 = vmul.f32 %v2469_v53, %v3040_v23  ;;  %v1356_v34 = vmul.f32 %v2469_v53, %v3038_v51 }
 0x45a   : > { %2474 = vrcp.f32 %v1312_v41 }
 0x45b   : > { %1479 = vmatprep.mubr.f32.mxu0 %v1357_v8  ;;  %1584 = vst [vmem:[%s2632_s6 + $0x98] sm:$0xff] %v1357_v8  ;;  %1583 = vst [vmem:[%s2632_s6 + $0x90] sm:$0xff] %v1356_v34 }
 0x45c   : > { %v2471_v7 = vpop.eup %2470  ;;  %1480 = vmatmul.mubr.f32.gmra.mrb[34].mxu0 %v1356_v34 }
 0x45d   : > { %v1315_v46 = vpop.xlane.xlu1 %1314  ;;  %v1359_v63 = vmul.f32 %v2471_v7, %v3048_v55  ;;  %v1358_v50 = vmul.f32 %v2471_v7, %v3046_v60  ;;  %v2488_v7 = vld [vmem:[%s2772_s28 + $0x30] sm:$0xff] }
 0x45e   : > { %2476 = vrcp.f32 %v1315_v46 }
 0x45f   : > { %1484 = vmatprep.mubr.f32.mxu0 %v1359_v63  ;;  %1586 = vst [vmem:[%s2632_s6 + $0xa8] sm:$0xff] %v1359_v63  ;;  %1585 = vst [vmem:[%s2632_s6 + $0xa0] sm:$0xff] %v1358_v50 }
 0x460   : > { %v2473_v23 = vpop.eup %2472  ;;  %1485 = vmatmul.mubr.f32.gmra.mrb[36].mxu0 %v1358_v50 }
 0x461   : > { %v1318_v51 = vpop.xlane.xlu0 %1317  ;;  %v1361_v20 = vmul.f32 %v2473_v23, %v3056_v40  ;;  %v1360_v52 = vmul.f32 %v2473_v23, %v3054_v3 }
 0x462   : > { %2478 = vrcp.f32 %v1318_v51 }
 0x463   : > { %1489 = vmatprep.mubr.f32.mxu0 %v1361_v20  ;;  %1588 = vst [vmem:[%s2632_s6 + $0xb8] sm:$0xff] %v1361_v20  ;;  %1587 = vst [vmem:[%s2632_s6 + $0xb0] sm:$0xff] %v1360_v52  ;;  %v2489_v20 = vld [vmem:[%s2772_s28 + $0x38] sm:$0xff] }
 0x464   : > { %v2475_v60 = vpop.eup %2474  ;;  %1490 = vmatmul.mubr.f32.gmra.mrb[38].mxu0 %v1360_v52 }
 0x465   : > { %v1321_v55 = vpop.xlane.xlu1 %1320  ;;  %v1363_v62 = vmul.f32 %v2475_v60, %v3064_v45  ;;  %v1362_v2 = vmul.f32 %v2475_v60, %v3062_v12 }
 0x466   : > { %2480 = vrcp.f32 %v1321_v55 }
 0x467   : > { %1494 = vmatprep.mubr.f32.mxu0 %v1363_v62  ;;  %1590 = vst [vmem:[%s2632_s6 + $0xc8] sm:$0xff] %v1363_v62  ;;  %1589 = vst [vmem:[%s2632_s6 + $0xc0] sm:$0xff] %v1362_v2 }
 0x468   : > { %v2477_v3 = vpop.eup %2476  ;;  %1495 = vmatmul.mubr.f32.gmra.mrb[40].mxu0 %v1362_v2 }
 0x469   : > { %v1365_v40 = vmul.f32 %v2477_v3, %v3070_v17  ;;  %v1364_v44 = vmul.f32 %v2477_v3, %v3068_v4  ;;  %v2490_v3 = vld [vmem:[%s2772_s28 + $0x40] sm:$0xff] }
 0x46b   : > { %1499 = vmatprep.mubr.f32.mxu0 %v1365_v40  ;;  %1592 = vst [vmem:[%s2632_s6 + $0xd8] sm:$0xff] %v1365_v40  ;;  %1591 = vst [vmem:[%s2632_s6 + $0xd0] sm:$0xff] %v1364_v44 }
 0x46c   : > { %v2479_v45 = vpop.eup %2478  ;;  %1500 = vmatmul.mubr.f32.gmra.mrb[42].mxu0 %v1364_v44 }
 0x46d   : > { %v1367_v12 = vmul.f32 %v2479_v45, %v3076_v39  ;;  %v1366_v14 = vmul.f32 %v2479_v45, %v3074_v6  ;;  %v3150_v6 = vstv %s1515_s17 }
 0x46f   : > { %1504 = vmatprep.mubr.f32.mxu0 %v1367_v12  ;;  %1594 = vst [vmem:[%s2632_s6 + $0xe8] sm:$0xff] %v1367_v12  ;;  %1593 = vst [vmem:[%s2632_s6 + $0xe0] sm:$0xff] %v1366_v14 }
 0x470   : > { %v2481_v5 = vpop.eup %2480  ;;  %1505 = vmatmul.mubr.f32.gmra.mrb[44].mxu0 %v1366_v14 }
 0x471   : > { %v1369_v17 = vmul.f32 %v2481_v5, %v3082_v61  ;;  %v1368_v4 = vmul.f32 %v2481_v5, %v3080_v11  ;;  %v2491_v5 = vld [vmem:[%s2772_s28 + $0x48] sm:$0xff] }
 0x473   : > { %1509 = vmatprep.mubr.f32.mxu0 %v1369_v17  ;;  %1596 = vst [vmem:[%s2632_s6 + $0xf8] sm:$0xff] %v1369_v17  ;;  %1595 = vst [vmem:[%s2632_s6 + $0xf0] sm:$0xff] %v1368_v4 }
 0x474   : > { %1510 = vmatmul.mubr.f32.gmra.mrb[46].mxu0 %v1368_v4 }
 0x50b   : > { %v1970_v39 = vpop.f32.mrb[16].mxu0 }
 0x50c   : > { %v1971_v13 = vpop.f32.mrb[17].mxu0 }
 0x50d   : > { %v1972_v15 = vadd.f32 %v1971_v13, %v1970_v39 }
 0x50f   : > { %v1517_v18 = vmul.f32 %v1972_v15, %v3150_v6  ;;  %v1973_v49 = vpop.f32.mrb[18].mxu0 }
 0x510   : > { %v1974_v61 = vpop.f32.mrb[19].mxu0 }
 0x511   : > { %v1533_v11 = vadd.f32 %v2482_v19, %v1517_v18  ;;  %v1975_v22 = vadd.f32 %v1974_v61, %v1973_v49  ;;  %v2492_v18 = vld [vmem:[%s2772_s28 + $0x50] sm:$0xff] }
 0x513   : > { %1549 = vst [vmem:[%s2627_s24] sm:$0xff] %v1533_v11  ;;  %v1518_v27 = vmul.f32 %v1975_v22, %v3150_v6  ;;  %v1976_v1 = vpop.f32.mrb[20].mxu0 }
 0x514   : > { %v1977_v48 = vpop.f32.mrb[21].mxu0 }
 0x515   : > { %v1534_v30 = vadd.f32 %v2483_v28, %v1518_v27  ;;  %v1978_v58 = vadd.f32 %v1977_v48, %v1976_v1  ;;  %v2493_v27 = vld [vmem:[%s2772_s28 + $0x58] sm:$0xff] }
 0x517   : > { %1550 = vst [vmem:[%s2627_s24 + $0x8] sm:$0xff] %v1534_v30  ;;  %v1519_v9 = vmul.f32 %v1978_v58, %v3150_v6  ;;  %v1979_v54 = vpop.f32.mrb[22].mxu0 }
 0x518   : > { %v1980_v24 = vpop.f32.mrb[23].mxu0 }
 0x519   : > { %v1535_v16 = vadd.f32 %v2484_v10, %v1519_v9  ;;  %v1981_v32 = vadd.f32 %v1980_v24, %v1979_v54  ;;  %v2494_v9 = vld [vmem:[%s2772_s28 + $0x60] sm:$0xff] }
 0x51b   : > { %1551 = vst [vmem:[%s2627_s24 + $0x10] sm:$0xff] %v1535_v16  ;;  %v1520_v57 = vmul.f32 %v1981_v32, %v3150_v6  ;;  %v1982_v25 = vpop.f32.mrb[24].mxu0 }
 0x51c   : > { %v1983_v21 = vpop.f32.mrb[25].mxu0 }
 0x51d   : > { %v1536_v37 = vadd.f32 %v2485_v35, %v1520_v57  ;;  %v1984_v33 = vadd.f32 %v1983_v21, %v1982_v25  ;;  %v2495_v57 = vld [vmem:[%s2772_s28 + $0x68] sm:$0xff] }
 0x51f   : > { %1552 = vst [vmem:[%s2627_s24 + $0x18] sm:$0xff] %v1536_v37  ;;  %v1521_v26 = vmul.f32 %v1984_v33, %v3150_v6  ;;  %v1985_v0 = vpop.f32.mrb[26].mxu0 }
 0x520   : > { %v1986_v29 = vpop.f32.mrb[27].mxu0 }
 0x521   : > { %v1537_v31 = vadd.f32 %v2486_v59, %v1521_v26  ;;  %v1987_v38 = vadd.f32 %v1986_v29, %v1985_v0  ;;  %v2496_v26 = vld [vmem:[%s2772_s28 + $0x70] sm:$0xff] }
 0x523   : > { %1553 = vst [vmem:[%s2627_s24 + $0x20] sm:$0xff] %v1537_v31  ;;  %v1522_v56 = vmul.f32 %v1987_v38, %v3150_v6  ;;  %v1988_v47 = vpop.f32.mrb[28].mxu0  ;;  %v2497_v31 = vld [vmem:[%s2772_s28 + $0x78] sm:$0xff] }
 0x524   : > { %v1989_v36 = vpop.f32.mrb[29].mxu0 }
 0x525   : > { %v1538_v43 = vadd.f32 %v2487_v42, %v1522_v56  ;;  %v1990_v53 = vadd.f32 %v1989_v36, %v1988_v47 }
 0x527   : > { %1554 = vst [vmem:[%s2627_s24 + $0x28] sm:$0xff] %v1538_v43  ;;  %v1523_v41 = vmul.f32 %v1990_v53, %v3150_v6  ;;  %v1991_v8 = vpop.f32.mrb[30].mxu0 }
 0x528   : > { %v1992_v34 = vpop.f32.mrb[31].mxu0 }
 0x529   : > { %v1539_v46 = vadd.f32 %v2488_v7, %v1523_v41  ;;  %v1993_v63 = vadd.f32 %v1992_v34, %v1991_v8 }
 0x52b   : > { %1555 = vst [vmem:[%s2627_s24 + $0x30] sm:$0xff] %v1539_v46  ;;  %v1524_v50 = vmul.f32 %v1993_v63, %v3150_v6  ;;  %v1994_v23 = vpop.f32.mrb[32].mxu0 }
 0x52c   : > { %v1995_v51 = vpop.f32.mrb[33].mxu0 }
 0x52d   : > { %v1540_v52 = vadd.f32 %v2489_v20, %v1524_v50  ;;  %v1996_v60 = vadd.f32 %v1995_v51, %v1994_v23 }
 0x52f   : > { %1556 = vst [vmem:[%s2627_s24 + $0x38] sm:$0xff] %v1540_v52  ;;  %v1525_v55 = vmul.f32 %v1996_v60, %v3150_v6  ;;  %v1997_v62 = vpop.f32.mrb[34].mxu0 }
 0x530   : > { %v1998_v2 = vpop.f32.mrb[35].mxu0 }
 0x531   : > { %v1541_v40 = vadd.f32 %v2490_v3, %v1525_v55  ;;  %v1999_v44 = vadd.f32 %v1998_v2, %v1997_v62 }
 0x533   : > { %1557 = vst [vmem:[%s2627_s24 + $0x40] sm:$0xff] %v1541_v40  ;;  %v1526_v45 = vmul.f32 %v1999_v44, %v3150_v6  ;;  %v2000_v12 = vpop.f32.mrb[36].mxu0 }
 0x534   : > { %v2001_v14 = vpop.f32.mrb[37].mxu0 }
 0x535   : > { %v1542_v17 = vadd.f32 %v2491_v5, %v1526_v45  ;;  %v2002_v4 = vadd.f32 %v2001_v14, %v2000_v12 }
 0x537   : > { %1558 = vst [vmem:[%s2627_s24 + $0x48] sm:$0xff] %v1542_v17  ;;  %v1527_v39 = vmul.f32 %v2002_v4, %v3150_v6  ;;  %v2003_v13 = vpop.f32.mrb[38].mxu0 }
 0x538   : > { %v2004_v15 = vpop.f32.mrb[39].mxu0 }
 0x539   : > { %v1543_v49 = vadd.f32 %v2492_v18, %v1527_v39  ;;  %v2005_v61 = vadd.f32 %v2004_v15, %v2003_v13 }
 0x53b   : > { %1559 = vst [vmem:[%s2627_s24 + $0x50] sm:$0xff] %v1543_v49  ;;  %v1528_v19 = vmul.f32 %v2005_v61, %v3150_v6  ;;  %v2006_v11 = vpop.f32.mrb[40].mxu0 }
 0x53c   : > { %v2007_v22 = vpop.f32.mrb[41].mxu0 }
 0x53d   : > { %v1544_v1 = vadd.f32 %v2493_v27, %v1528_v19  ;;  %v2008_v48 = vadd.f32 %v2007_v22, %v2006_v11 }
 0x53f   : > { %1560 = vst [vmem:[%s2627_s24 + $0x58] sm:$0xff] %v1544_v1  ;;  %v1529_v28 = vmul.f32 %v2008_v48, %v3150_v6  ;;  %v2009_v30 = vpop.f32.mrb[42].mxu0 }
 0x540   : > { %v2010_v58 = vpop.f32.mrb[43].mxu0 }
 0x541   : > { %v1545_v54 = vadd.f32 %v2494_v9, %v1529_v28  ;;  %v2011_v24 = vadd.f32 %v2010_v58, %v2009_v30 }
 0x543   : > { %1561 = vst [vmem:[%s2627_s24 + $0x60] sm:$0xff] %v1545_v54  ;;  %v1530_v10 = vmul.f32 %v2011_v24, %v3150_v6  ;;  %v2012_v16 = vpop.f32.mrb[44].mxu0 }
 0x544   : > { %v2013_v32 = vpop.f32.mrb[45].mxu0 }
 0x545   : > { %v1546_v25 = vadd.f32 %v2495_v57, %v1530_v10  ;;  %v2014_v21 = vadd.f32 %v2013_v32, %v2012_v16 }
 0x547   : > { %1562 = vst [vmem:[%s2627_s24 + $0x68] sm:$0xff] %v1546_v25  ;;  %v1531_v35 = vmul.f32 %v2014_v21, %v3150_v6  ;;  %v2015_v37 = vpop.f32.mrb[46].mxu0 }
 0x548   : > { %v2016_v33 = vpop.f32.mrb[47].mxu0 }
 0x549   : > { %v1547_v0 = vadd.f32 %v2496_v26, %v1531_v35  ;;  %v2017_v29 = vadd.f32 %v2016_v33, %v2015_v37 }
 0x54b   : > { %1563 = vst [vmem:[%s2627_s24 + $0x70] sm:$0xff] %v1547_v0  ;;  %v1532_v59 = vmul.f32 %v2017_v29, %v3150_v6 }
 0x54d   : > { %v1548_v38 = vadd.f32 %v2497_v31, %v1532_v59 }
 0x54f   : > { %1564 = vst [vmem:[%s2627_s24 + $0x78] sm:$0xff] %v1548_v38 }
 0x550 PF: > { %s20_s11 = sadd.s32 1, %s2536_s11   ;;  %s3226_s6 = sld [smem:[#allocation4_spill]] }
 0x551   : > { %p17_p8 = scmp.ge.s32.totalorder %s20_s11, 6   ;;  %s3227_s12 = sld [smem:[#allocation5_spill]] }
 0x552   : > { %s3228_s29 = smov %s2528_s9  ;;  %s3229_s30 = smov %s2532_s10 }
 0x553   :  { %19 = sbr.rel (!%p17_p8) target bundleno = 3 (0x3), region = 97 }
 0x556   : > { %s3230_s9 = smov %s3226_s6 }
 0x557   : > { %s3231_s10 = smov %s3227_s12 }

</bundles_post_ra>
